<compile_context>
chip_gen: v7x
topology: tpu7x:2x2x1
jax: 0.10.0
libtpu: 0.0.40
codegen_flags: <defaults>
</compile_context>

<pallas_src>
import functools

import jax
import jax.numpy as jnp
from jax import lax
from jax.experimental import pallas as pl
from jax.experimental.pallas import tpu as pltpu


_VMEM_LIMIT = 32 * 1024 * 1024       # <= default/physical scoped VMEM on v5e/v6e/v7x
_CHUNK_IO_BUDGET = 8 * 1024 * 1024   # budget for the double-buffered LSTM chunk I/O


# ------------------------- shared tiled linear kernel -------------------------

def linear_kernel(x_ref, w_ref, b_ref, o_ref):
    # bf16 (or f32) operands, f32 MXU accumulation, f32 output.
    o_ref[...] = (jnp.dot(x_ref[...], w_ref[...],
                          preferred_element_type=jnp.float32)
                  + b_ref[...]).astype(o_ref.dtype)


def _tile_dim(dim, cap):
    # cap is hardware-aligned (multiple of 8 for rows, 128 for cols); a
    # full-extent block is always legal when dim <= cap.
    return dim if dim <= cap else cap


def linear_forward(x, w, b, *, tile_rows=512, tile_cols=512):
    """y = x @ w + b with a 2-D parallel tiling (rows x output-cols)."""
    N, K = x.shape
    Kw, M = w.shape
    assert K == Kw and b.shape == (1, M)
    tn = _tile_dim(N, tile_rows)     # multiple of 8 (or full N)
    tm = _tile_dim(M, tile_cols)     # multiple of 128 (or full M), lane-dense
    grid = (pl.cdiv(N, tn), pl.cdiv(M, tm))
    return pl.pallas_call(
        linear_kernel,
        out_shape=jax.ShapeDtypeStruct((N, M), jnp.float32),
        grid_spec=pltpu.PrefetchScalarGridSpec(
            num_scalar_prefetch=0,
            grid=grid,
            in_specs=[
                pl.BlockSpec((tn, K), lambda i, j: (i, 0)),
                pl.BlockSpec((K, tm), lambda i, j: (0, j)),
                pl.BlockSpec((1, tm), lambda i, j: (0, j)),
            ],
            out_specs=pl.BlockSpec((tn, tm), lambda i, j: (i, j)),
        ),
        compiler_params=pltpu.CompilerParams(
            dimension_semantics=("parallel", "parallel"),
            vmem_limit_bytes=_VMEM_LIMIT),
    )(x, w, b)


# ------------------------- LSTM recurrence kernel -------------------------

def lstm_kernel(gx_ref, whh_ref, out_ref, cn_ref, h_scr, c_scr, *,
                t_chunk, hidden, seq_len, needs_mask, unroll):
    # gx_ref : (tc, Bblk, 4H) f32 pre-gates = x @ W_ih + (b_ih + b_hh),
    #          hoisted out of the recurrence into one big GEMM.
    # out_ref: (tc, Bblk, H)  per-step hidden states, time-major.
    # cn_ref : (Bblk, H)      final cell state (resident, written once).
    t = pl.program_id(1)

    @pl.when(t == 0)
    def _():
        h_scr[...] = jnp.zeros_like(h_scr)
        c_scr[...] = jnp.zeros_like(c_scr)

    H = hidden
    base = t * t_chunk

    # TODO(synk): hold W_hh in the MXU weight registers for the whole chunk via
    # pltpu.matmul_push_rhs / matmul_acc_lhs / matmul_pop instead of re-pushing
    # the RHS on every jnp.dot when B << MXU width.
    def step(s, carry):
        gx = gx_ref[s]                                           # (Bblk, 4H) slab
        h_in = h_scr[...].astype(whh_ref.dtype)                  # bf16 for the MXU
        gates = gx + jnp.dot(h_in, whh_ref[...],
                             preferred_element_type=jnp.float32)
        # PyTorch gate order: [i, f, g, o]; gate math stays f32.
        i = jax.nn.sigmoid(gates[:, 0 * H:1 * H])
        f = jax.nn.sigmoid(gates[:, 1 * H:2 * H])
        g = jnp.tanh(gates[:, 2 * H:3 * H])
        o = jax.nn.sigmoid(gates[:, 3 * H:4 * H])

        c = f * c_scr[...] + i * g
        h = o * jnp.tanh(c)

        if needs_mask:  # static flag: only emitted when T was zero-padded
            valid = (base + s) < seq_len
            c = jnp.where(valid, c, c_scr[...])
            h = jnp.where(valid, h, h_scr[...])

        c_scr[...] = c
        h_scr[...] = h
        out_ref[s] = h.astype(out_ref.dtype)                     # (Bblk, H) slab
        return carry

    lax.fori_loop(0, t_chunk, step, 0, unroll=unroll)

    # Final c_n written only once, on the last time step of this batch block.
    @pl.when(t == pl.num_programs(1) - 1)
    def _():
        cn_ref[...] = c_scr[...]


def _pick_b_block(B):
    # Two batch blocks let the 'parallel' grid axis shard the recurrence
    # across v7x's two TensorCores; keep each block sublane-aligned.
    if B % 16 == 0:
        return B // 2
    return B


def _pick_t_chunk(T, b_blk, hidden, out_bytes):
    # Cap t_chunk so the double-buffered (gx in + h out) chunk fits the budget.
    per_step = b_blk * hidden * (4 * 4 + out_bytes)   # 4H f32 in + H out
    cap = _CHUNK_IO_BUDGET // (2 * max(per_step, 1))
    cap = max(8, min(int(cap), 128))
    return min(T, cap)


def lstm_forward(gx_tbh, w_hh, *, out_dtype):
    """gx_tbh: (T, B, 4H) f32 pre-gates; w_hh: (H, 4H) = weight_hh_l0.T"""
    T, B, G = gx_tbh.shape
    H = w_hh.shape[0]
    assert G == 4 * H

    b_blk = _pick_b_block(B)
    tc = _pick_t_chunk(T, b_blk, H, jnp.dtype(out_dtype).itemsize)
    t_pad = ((T + tc - 1) // tc) * tc
    if t_pad != T:
        # Zero-pad awkward/prime T; padded steps are masked inside the kernel.
        gx_tbh = jnp.pad(gx_tbh, ((0, t_pad - T), (0, 0), (0, 0)))
    grid = (B // b_blk, t_pad // tc)

    kernel = functools.partial(
        lstm_kernel, t_chunk=tc, hidden=H, seq_len=T,
        needs_mask=(t_pad != T), unroll=min(tc, 8))

    out_full, c_n = pl.pallas_call(
        kernel,
        out_shape=(
            jax.ShapeDtypeStruct((t_pad, B, H), out_dtype),  # per-step h, (T,B,H)
            jax.ShapeDtypeStruct((B, H), jnp.float32),       # c_n
        ),
        grid_spec=pltpu.PrefetchScalarGridSpec(
            num_scalar_prefetch=0,
            grid=grid,
            in_specs=[
                pl.BlockSpec((tc, b_blk, G), lambda b, t: (t, b, 0)),  # pre-gates
                pl.BlockSpec((H, G), lambda b, t: (0, 0)),             # W_hh^T resident
            ],
            out_specs=[
                pl.BlockSpec((tc, b_blk, H), lambda b, t: (t, b, 0)),  # h chunk
                pl.BlockSpec((b_blk, H), lambda b, t: (b, 0)),         # c_n resident
            ],
            scratch_shapes=[pltpu.VMEM((b_blk, H), jnp.float32),
                            pltpu.VMEM((b_blk, H), jnp.float32)],
        ),
        compiler_params=pltpu.CompilerParams(
            dimension_semantics=("parallel", "arbitrary"),
            vmem_limit_bytes=_VMEM_LIMIT),
    )(gx_tbh, w_hh)

    return out_full[:T], c_n


# ------------------------- Module wrapper -------------------------

def init_params(key, vocab_size, embed_size, hidden_size):
    ks = jax.random.split(key, 7)
    k_lstm = 1.0 / jnp.sqrt(hidden_size)
    k_fc = 1.0 / jnp.sqrt(hidden_size)

    embed = jax.random.normal(ks[0], (vocab_size, embed_size), jnp.float32)
    embed = embed.at[0].set(0.0)  # padding_idx=0 row is zero-initialized

    w_ih = jax.random.uniform(ks[1], (embed_size, 4 * hidden_size),
                              jnp.float32, -k_lstm, k_lstm)   # = weight_ih_l0.T
    w_hh = jax.random.uniform(ks[2], (hidden_size, 4 * hidden_size),
                              jnp.float32, -k_lstm, k_lstm)   # = weight_hh_l0.T
    b_ih = jax.random.uniform(ks[3], (4 * hidden_size,), jnp.float32, -k_lstm, k_lstm)
    b_hh = jax.random.uniform(ks[4], (4 * hidden_size,), jnp.float32, -k_lstm, k_lstm)
    b = (b_ih + b_hh).reshape(1, 4 * hidden_size)

    w_fc = jax.random.uniform(ks[5], (hidden_size, vocab_size),
                              jnp.float32, -k_fc, k_fc)       # = fc.weight.T
    b_fc = jax.random.uniform(ks[6], (vocab_size,),
                              jnp.float32, -k_fc, k_fc).reshape(1, vocab_size)

    return dict(embed=embed, w_ih=w_ih, w_hh=w_hh, b=b, w_fc=w_fc, b_fc=b_fc)


@functools.partial(jax.jit, static_argnames=("compute_dtype",))
def word_rnn_forward(params, x_ids, compute_dtype=jnp.bfloat16):
    # x_ids: (B, T) int32
    B, T = x_ids.shape
    H = params['w_hh'].shape[0]
    cd = compute_dtype

    # GEMM operands in the compute dtype (bf16 for production); biases,
    # accumulation, and gate math stay f32.
    embed = params['embed'].astype(cd)
    w_ih = params['w_ih'].astype(cd)
    w_hh = params['w_hh'].astype(cd)
    w_fc = params['w_fc'].astype(cd)

    # TODO(synk): fuse this gather into the input-projection kernel (scalar-
    # prefetched ids + manual DMA gather) to skip the (T, B, E) HBM round trip.
    emb = jnp.take(embed, x_ids, axis=0)                 # (B, T, E)
    emb_tbe = jnp.transpose(emb, (1, 0, 2))              # (T, B, E) time-major

    # Hoisted input projection: one big MXU GEMM over all T*B tokens.
    gx = linear_forward(emb_tbe.reshape(T * B, emb.shape[-1]),
                        w_ih, params['b'])               # (T*B, 4H) f32
    gx = gx.reshape(T, B, 4 * H)

    # Serial recurrence: only h @ W_hh per step inside the kernel.
    out_tbh, c_n = lstm_forward(gx, w_hh, out_dtype=cd)  # (T, B, H), (B, H)
    h_n = out_tbh[T - 1].astype(jnp.float32)

    # Single transpose back to batch-major so logits row order matches
    # PyTorch's output.contiguous().view(-1, H) (batch_first).
    out_flat = jnp.transpose(out_tbh, (1, 0, 2)).reshape(B * T, H)
    logits = linear_forward(out_flat, w_fc, params['b_fc'])   # (B*T, V) f32

    # hidden matches PyTorch: (h_n, c_n), each (num_layers=1, B, H)
    return logits, (h_n[None, ...], c_n[None, ...])


# ------------------------- pure-JAX reference -------------------------

def reference_forward(params, x_ids):
    H = params['w_hh'].shape[0]
    B = x_ids.shape[0]
    emb = jnp.take(params['embed'], x_ids, axis=0)

    def step(carry, x_t):
        h, c = carry
        gates = x_t @ params['w_ih'] + h @ params['w_hh'] + params['b'][0]
        i = jax.nn.sigmoid(gates[:, 0 * H:1 * H])
        f = jax.nn.sigmoid(gates[:, 1 * H:2 * H])
        g = jnp.tanh(gates[:, 2 * H:3 * H])
        o = jax.nn.sigmoid(gates[:, 3 * H:4 * H])
        c = f * c + i * g
        h = o * jnp.tanh(c)
        return (h, c), h

    init = (jnp.zeros((B, H), jnp.float32), jnp.zeros((B, H), jnp.float32))
    (h_n, c_n), outs = jax.lax.scan(step, init, jnp.transpose(emb, (1, 0, 2)))
    out_flat = jnp.transpose(outs, (1, 0, 2)).reshape(-1, H)
    logits = out_flat @ params['w_fc'] + params['b_fc'][0]
    return logits, (h_n[None, ...], c_n[None, ...])


if __name__ == "__main__":
    vocab_size, embed_size, hidden_size, num_layers = 32, 16, 32, 1
    B, T = 2, 8

    key = jax.random.PRNGKey(0)
    k_params, k_ids = jax.random.split(key)
    params = init_params(k_params, vocab_size, embed_size, hidden_size)
    x_ids = jax.random.randint(k_ids, (B, T), 0, vocab_size, dtype=jnp.int32)
    x_ids = x_ids.at[0, -2:].set(0)  # include some padding tokens (padding_idx=0)

    ref_logits, (ref_h, ref_c) = reference_forward(params, x_ids)

    # f32 path: numerically faithful to the PyTorch forward (tight tolerances).
    logits, (h_n, c_n) = word_rnn_forward(params, x_ids, compute_dtype=jnp.float32)
    jax.block_until_ready((logits, h_n, c_n))
    assert logits.shape == (B * T, vocab_size)
    assert h_n.shape == (num_layers, B, hidden_size)
    assert c_n.shape == (num_layers, B, hidden_size)
    assert jnp.allclose(logits, ref_logits, atol=1e-5, rtol=1e-5)
    assert jnp.allclose(h_n, ref_h, atol=1e-5, rtol=1e-5)
    assert jnp.allclose(c_n, ref_c, atol=1e-5, rtol=1e-5)

    # bf16-operand MXU path (the production performance configuration):
    # GEMM inputs rounded to bf16 -> looser tolerances against the f32 reference.
    logits_bf, (h_bf, c_bf) = word_rnn_forward(params, x_ids,
                                               compute_dtype=jnp.bfloat16)
    jax.block_until_ready((logits_bf, h_bf, c_bf))
    assert jnp.allclose(logits_bf, ref_logits, atol=1e-1, rtol=5e-2)
    assert jnp.allclose(h_bf, ref_h, atol=1e-1, rtol=5e-2)
    assert jnp.allclose(c_bf, ref_c, atol=1e-1, rtol=5e-2)

    print("KERNEL_OK")
</pallas_src>

<mosaic_0001>
module attributes {stable_mosaic.version = 11 : i64} {
  func.func @linear_kernel(%arg0: i32, %arg1: i32, %arg2: memref<16x16xf32, #tpu.memory_space<vmem>>, %arg3: memref<16x128xf32, #tpu.memory_space<vmem>>, %arg4: memref<1x128xf32, #tpu.memory_space<vmem>>, %arg5: memref<16x128xf32, #tpu.memory_space<vmem>>) attributes {dimension_semantics = [#tpu.dimension_semantics<parallel>, #tpu.dimension_semantics<parallel>], iteration_bounds = array<i64: 1, 1>, scalar_prefetch = 0 : i64, scratch_operands = 0 : i64, tpu.core_type = #tpu.core_type<tc>, window_params = [{transform_indices = @transform_0, window_bounds = array<i64: 16, 16>}, {transform_indices = @transform_1, window_bounds = array<i64: 16, 128>}, {transform_indices = @transform_2, window_bounds = array<i64: 1, 128>}, {transform_indices = @transform_3, window_bounds = array<i64: 16, 128>}]} {
    %c0 = arith.constant 0 : index
    %c0_0 = arith.constant 0 : index
    %0 = vector.load %arg2[%c0, %c0_0] : memref<16x16xf32, #tpu.memory_space<vmem>>, vector<16x16xf32>
    %c0_1 = arith.constant 0 : index
    %c0_2 = arith.constant 0 : index
    %1 = vector.load %arg3[%c0_1, %c0_2] : memref<16x128xf32, #tpu.memory_space<vmem>>, vector<16x128xf32>
    %cst = arith.constant dense<0.000000e+00> : vector<16x128xf32>
    %2 = tpu.matmul %0, %1, %cst {dimension_numbers = #tpu.dot_dimension_numbers<[1], [0], [0], [1], [0, 0, 1, 1], [], []>} : vector<16x16xf32>, vector<16x128xf32>, vector<16x128xf32> -> vector<16x128xf32>
    %c0_3 = arith.constant 0 : index
    %c0_4 = arith.constant 0 : index
    %3 = vector.load %arg4[%c0_3, %c0_4] : memref<1x128xf32, #tpu.memory_space<vmem>>, vector<1x128xf32>
    %4 = vector.broadcast %3 : vector<1x128xf32> to vector<16x128xf32>
    %5 = arith.addf %2, %4 : vector<16x128xf32>
    %c0_5 = arith.constant 0 : index
    %c0_6 = arith.constant 0 : index
    %6 = vector.load %arg5[%c0_5, %c0_6] : memref<16x128xf32, #tpu.memory_space<vmem>>, vector<16x128xf32>
    tpu.vector_store %arg5[%c0_5, %c0_6], %5 {strides = array<i32>} : memref<16x128xf32, #tpu.memory_space<vmem>>, vector<16x128xf32>,
    return
  }
  func.func @transform_0(%arg0: i32, %arg1: i32) -> (i32, i32) {
    %c0_i32 = arith.constant 0 : i32
    %c0_i32_0 = arith.constant 0 : i32
    return %arg0, %c0_i32 : i32, i32
  }
  func.func @transform_1(%arg0: i32, %arg1: i32) -> (i32, i32) {
    %c0_i32 = arith.constant 0 : i32
    %c0_i32_0 = arith.constant 0 : i32
    return %c0_i32, %arg1 : i32, i32
  }
  func.func @transform_2(%arg0: i32, %arg1: i32) -> (i32, i32) {
    %c0_i32 = arith.constant 0 : i32
    %c0_i32_0 = arith.constant 0 : i32
    return %c0_i32, %arg1 : i32, i32
  }
  func.func @transform_3(%arg0: i32, %arg1: i32) -> (i32, i32) {
    %c0_i32 = arith.constant 0 : i32
    return %arg0, %arg1 : i32, i32
  }
}

module attributes {stable_mosaic.version = 11 : i64} {
  func.func @linear_kernel(%arg0: i32, %arg1: i32, %arg2: memref<16x32xf32, #tpu.memory_space<vmem>>, %arg3: memref<32x32xf32, #tpu.memory_space<vmem>>, %arg4: memref<1x32xf32, #tpu.memory_space<vmem>>, %arg5: memref<16x32xf32, #tpu.memory_space<vmem>>) attributes {dimension_semantics = [#tpu.dimension_semantics<parallel>, #tpu.dimension_semantics<parallel>], iteration_bounds = array<i64: 1, 1>, scalar_prefetch = 0 : i64, scratch_operands = 0 : i64, tpu.core_type = #tpu.core_type<tc>, window_params = [{transform_indices = @transform_0, window_bounds = array<i64: 16, 32>}, {transform_indices = @transform_1, window_bounds = array<i64: 32, 32>}, {transform_indices = @transform_2, window_bounds = array<i64: 1, 32>}, {transform_indices = @transform_3, window_bounds = array<i64: 16, 32>}]} {
    %c0 = arith.constant 0 : index
    %c0_0 = arith.constant 0 : index
    %0 = vector.load %arg2[%c0, %c0_0] : memref<16x32xf32, #tpu.memory_space<vmem>>, vector<16x32xf32>
    %c0_1 = arith.constant 0 : index
    %c0_2 = arith.constant 0 : index
    %1 = vector.load %arg3[%c0_1, %c0_2] : memref<32x32xf32, #tpu.memory_space<vmem>>, vector<32x32xf32>
    %cst = arith.constant dense<0.000000e+00> : vector<16x32xf32>
    %2 = tpu.matmul %0, %1, %cst {dimension_numbers = #tpu.dot_dimension_numbers<[1], [0], [0], [1], [0, 0, 1, 1], [], []>} : vector<16x32xf32>, vector<32x32xf32>, vector<16x32xf32> -> vector<16x32xf32>
    %c0_3 = arith.constant 0 : index
    %c0_4 = arith.constant 0 : index
    %3 = vector.load %arg4[%c0_3, %c0_4] : memref<1x32xf32, #tpu.memory_space<vmem>>, vector<1x32xf32>
    %4 = vector.broadcast %3 : vector<1x32xf32> to vector<16x32xf32>
    %5 = arith.addf %2, %4 : vector<16x32xf32>
    %c0_5 = arith.constant 0 : index
    %c0_6 = arith.constant 0 : index
    %6 = vector.load %arg5[%c0_5, %c0_6] : memref<16x32xf32, #tpu.memory_space<vmem>>, vector<16x32xf32>
    tpu.vector_store %arg5[%c0_5, %c0_6], %5 {strides = array<i32>} : memref<16x32xf32, #tpu.memory_space<vmem>>, vector<16x32xf32>,
    return
  }
  func.func @transform_0(%arg0: i32, %arg1: i32) -> (i32, i32) {
    %c0_i32 = arith.constant 0 : i32
    %c0_i32_0 = arith.constant 0 : i32
    return %arg0, %c0_i32 : i32, i32
  }
  func.func @transform_1(%arg0: i32, %arg1: i32) -> (i32, i32) {
    %c0_i32 = arith.constant 0 : i32
    %c0_i32_0 = arith.constant 0 : i32
    return %c0_i32, %arg1 : i32, i32
  }
  func.func @transform_2(%arg0: i32, %arg1: i32) -> (i32, i32) {
    %c0_i32 = arith.constant 0 : i32
    %c0_i32_0 = arith.constant 0 : i32
    return %c0_i32, %arg1 : i32, i32
  }
  func.func @transform_3(%arg0: i32, %arg1: i32) -> (i32, i32) {
    %c0_i32 = arith.constant 0 : i32
    return %arg0, %arg1 : i32, i32
  }
}

module attributes {stable_mosaic.version = 11 : i64} {
  func.func @lstm_kernel(%arg0: i32, %arg1: i32, %arg2: memref<8x2x128xf32, #tpu.memory_space<vmem>>, %arg3: memref<32x128xf32, #tpu.memory_space<vmem>>, %arg4: memref<8x2x32xf32, #tpu.memory_space<vmem>>, %arg5: memref<2x32xf32, #tpu.memory_space<vmem>>, %arg6: memref<2x32xf32, #tpu.memory_space<vmem>>, %arg7: memref<2x32xf32, #tpu.memory_space<vmem>>) attributes {dimension_semantics = [#tpu.dimension_semantics<parallel>, #tpu.dimension_semantics<arbitrary>], iteration_bounds = array<i64: 1, 1>, scalar_prefetch = 0 : i64, scratch_operands = 2 : i64, tpu.core_type = #tpu.core_type<tc>, window_params = [{transform_indices = @transform_0, window_bounds = array<i64: 8, 2, 128>}, {pipeline_mode = #tpu.pipeline_mode<synchronous>, transform_indices = @transform_1, window_bounds = array<i64: 32, 128>}, {transform_indices = @transform_2, window_bounds = array<i64: 8, 2, 32>}, {transform_indices = @transform_3, window_bounds = array<i64: 2, 32>}]} {
    %c0_i32 = arith.constant 0 : i32
    %0 = arith.cmpi eq, %arg1, %c0_i32 : i32
    %1 = arith.extui %0 : i1 to i32
    %c0_i32_0 = arith.constant 0 : i32
    %2 = arith.cmpi ne, %1, %c0_i32_0 : i32
    scf.if %2 {
      %cst_146 = arith.constant 0.000000e+00 : f32
      %318 = vector.broadcast %cst_146 : f32 to vector<2x32xf32>
      %c0_147 = arith.constant 0 : index
      %c0_148 = arith.constant 0 : index
      %319 = vector.load %arg6[%c0_147, %c0_148] : memref<2x32xf32, #tpu.memory_space<vmem>>, vector<2x32xf32>
      tpu.vector_store %arg6[%c0_147, %c0_148], %318 {strides = array<i32>} : memref<2x32xf32, #tpu.memory_space<vmem>>, vector<2x32xf32>,
      %cst_149 = arith.constant 0.000000e+00 : f32
      %320 = vector.broadcast %cst_149 : f32 to vector<2x32xf32>
      %c0_150 = arith.constant 0 : index
      %c0_151 = arith.constant 0 : index
      %321 = vector.load %arg7[%c0_150, %c0_151] : memref<2x32xf32, #tpu.memory_space<vmem>>, vector<2x32xf32>
      tpu.vector_store %arg7[%c0_150, %c0_151], %320 {strides = array<i32>} : memref<2x32xf32, #tpu.memory_space<vmem>>, vector<2x32xf32>,
    } else {
    }
    %c0_i32_1 = arith.constant 0 : i32
    %3 = arith.index_cast %c0_i32_1 : i32 to index
    %c0 = arith.constant 0 : index
    %c0_2 = arith.constant 0 : index
    %4 = vector.load %arg2[%3, %c0, %c0_2] : memref<8x2x128xf32, #tpu.memory_space<vmem>>, vector<1x2x128xf32>
    %5 = vector.shape_cast %4 : vector<1x2x128xf32> to vector<2x128xf32>
    %c0_3 = arith.constant 0 : index
    %c0_4 = arith.constant 0 : index
    %6 = vector.load %arg6[%c0_3, %c0_4] : memref<2x32xf32, #tpu.memory_space<vmem>>, vector<2x32xf32>
    %c0_5 = arith.constant 0 : index
    %c0_6 = arith.constant 0 : index
    %7 = vector.load %arg3[%c0_5, %c0_6] : memref<32x128xf32, #tpu.memory_space<vmem>>, vector<32x128xf32>
    %cst = arith.constant dense<0.000000e+00> : vector<2x128xf32>
    %8 = tpu.matmul %6, %7, %cst {dimension_numbers = #tpu.dot_dimension_numbers<[1], [0], [0], [1], [0, 0, 1, 1], [], []>} : vector<2x32xf32>, vector<32x128xf32>, vector<2x128xf32> -> vector<2x128xf32>
    %9 = arith.addf %5, %8 : vector<2x128xf32>
    %10 = vector.extract_strided_slice %9 {offsets = [0, 0], sizes = [2, 32], strides = [1, 1]} : vector<2x128xf32> to vector<2x32xf32>
    %11 = arith.negf %10 : vector<2x32xf32>
    %12 = math.exp %11 : vector<2x32xf32>
    %cst_7 = arith.constant 1.000000e+00 : f32
    %13 = vector.broadcast %cst_7 : f32 to vector<2x32xf32>
    %14 = arith.addf %13, %12 : vector<2x32xf32>
    %15 = arith.divf %13, %14 : vector<2x32xf32>
    %16 = vector.extract_strided_slice %9 {offsets = [0, 32], sizes = [2, 32], strides = [1, 1]} : vector<2x128xf32> to vector<2x32xf32>
    %17 = arith.negf %16 : vector<2x32xf32>
    %18 = math.exp %17 : vector<2x32xf32>
    %cst_8 = arith.constant 1.000000e+00 : f32
    %19 = vector.broadcast %cst_8 : f32 to vector<2x32xf32>
    %20 = arith.addf %19, %18 : vector<2x32xf32>
    %21 = arith.divf %19, %20 : vector<2x32xf32>
    %22 = vector.extract_strided_slice %9 {offsets = [0, 64], sizes = [2, 32], strides = [1, 1]} : vector<2x128xf32> to vector<2x32xf32>
    %23 = math.tanh %22 : vector<2x32xf32>
    %24 = vector.extract_strided_slice %9 {offsets = [0, 96], sizes = [2, 32], strides = [1, 1]} : vector<2x128xf32> to vector<2x32xf32>
    %25 = arith.negf %24 : vector<2x32xf32>
    %26 = math.exp %25 : vector<2x32xf32>
    %cst_9 = arith.constant 1.000000e+00 : f32
    %27 = vector.broadcast %cst_9 : f32 to vector<2x32xf32>
    %28 = arith.addf %27, %26 : vector<2x32xf32>
    %29 = arith.divf %27, %28 : vector<2x32xf32>
    %c0_10 = arith.constant 0 : index
    %c0_11 = arith.constant 0 : index
    %30 = vector.load %arg7[%c0_10, %c0_11] : memref<2x32xf32, #tpu.memory_space<vmem>>, vector<2x32xf32>
    %31 = arith.mulf %21, %30 : vector<2x32xf32>
    %32 = arith.mulf %15, %23 : vector<2x32xf32>
    %33 = arith.addf %31, %32 : vector<2x32xf32>
    %34 = math.tanh %33 : vector<2x32xf32>
    %35 = arith.mulf %29, %34 : vector<2x32xf32>
    %c0_12 = arith.constant 0 : index
    %c0_13 = arith.constant 0 : index
    %36 = vector.load %arg7[%c0_12, %c0_13] : memref<2x32xf32, #tpu.memory_space<vmem>>, vector<2x32xf32>
    tpu.vector_store %arg7[%c0_12, %c0_13], %33 {strides = array<i32>} : memref<2x32xf32, #tpu.memory_space<vmem>>, vector<2x32xf32>,
    %c0_14 = arith.constant 0 : index
    %c0_15 = arith.constant 0 : index
    %37 = vector.load %arg6[%c0_14, %c0_15] : memref<2x32xf32, #tpu.memory_space<vmem>>, vector<2x32xf32>
    tpu.vector_store %arg6[%c0_14, %c0_15], %35 {strides = array<i32>} : memref<2x32xf32, #tpu.memory_space<vmem>>, vector<2x32xf32>,
    %38 = arith.index_cast %c0_i32_1 : i32 to index
    %c0_16 = arith.constant 0 : index
    %c0_17 = arith.constant 0 : index
    %39 = vector.load %arg4[%38, %c0_16, %c0_17] : memref<8x2x32xf32, #tpu.memory_space<vmem>>, vector<1x2x32xf32>
    %40 = vector.shape_cast %39 : vector<1x2x32xf32> to vector<2x32xf32>
    %41 = vector.shape_cast %35 : vector<2x32xf32> to vector<1x2x32xf32>
    tpu.vector_store %arg4[%38, %c0_16, %c0_17], %41 {strides = array<i32>} : memref<8x2x32xf32, #tpu.memory_space<vmem>>, vector<1x2x32xf32>,
    %c1_i32 = arith.constant 1 : i32
    %42 = arith.index_cast %c1_i32 : i32 to index
    %c0_18 = arith.constant 0 : index
    %c0_19 = arith.constant 0 : index
    %43 = vector.load %arg2[%42, %c0_18, %c0_19] : memref<8x2x128xf32, #tpu.memory_space<vmem>>, vector<1x2x128xf32>
    %44 = vector.shape_cast %43 : vector<1x2x128xf32> to vector<2x128xf32>
    %c0_20 = arith.constant 0 : index
    %c0_21 = arith.constant 0 : index
    %45 = vector.load %arg6[%c0_20, %c0_21] : memref<2x32xf32, #tpu.memory_space<vmem>>, vector<2x32xf32>
    %c0_22 = arith.constant 0 : index
    %c0_23 = arith.constant 0 : index
    %46 = vector.load %arg3[%c0_22, %c0_23] : memref<32x128xf32, #tpu.memory_space<vmem>>, vector<32x128xf32>
    %cst_24 = arith.constant dense<0.000000e+00> : vector<2x128xf32>
    %47 = tpu.matmul %45, %46, %cst_24 {dimension_numbers = #tpu.dot_dimension_numbers<[1], [0], [0], [1], [0, 0, 1, 1], [], []>} : vector<2x32xf32>, vector<32x128xf32>, vector<2x128xf32> -> vector<2x128xf32>
    %48 = arith.addf %44, %47 : vector<2x128xf32>
    %49 = vector.extract_strided_slice %48 {offsets = [0, 0], sizes = [2, 32], strides = [1, 1]} : vector<2x128xf32> to vector<2x32xf32>
    %50 = arith.negf %49 : vector<2x32xf32>
    %51 = math.exp %50 : vector<2x32xf32>
    %cst_25 = arith.constant 1.000000e+00 : f32
    %52 = vector.broadcast %cst_25 : f32 to vector<2x32xf32>
    %53 = arith.addf %52, %51 : vector<2x32xf32>
    %54 = arith.divf %52, %53 : vector<2x32xf32>
    %55 = vector.extract_strided_slice %48 {offsets = [0, 32], sizes = [2, 32], strides = [1, 1]} : vector<2x128xf32> to vector<2x32xf32>
    %56 = arith.negf %55 : vector<2x32xf32>
    %57 = math.exp %56 : vector<2x32xf32>
    %cst_26 = arith.constant 1.000000e+00 : f32
    %58 = vector.broadcast %cst_26 : f32 to vector<2x32xf32>
    %59 = arith.addf %58, %57 : vector<2x32xf32>
    %60 = arith.divf %58, %59 : vector<2x32xf32>
    %61 = vector.extract_strided_slice %48 {offsets = [0, 64], sizes = [2, 32], strides = [1, 1]} : vector<2x128xf32> to vector<2x32xf32>
    %62 = math.tanh %61 : vector<2x32xf32>
    %63 = vector.extract_strided_slice %48 {offsets = [0, 96], sizes = [2, 32], strides = [1, 1]} : vector<2x128xf32> to vector<2x32xf32>
    %64 = arith.negf %63 : vector<2x32xf32>
    %65 = math.exp %64 : vector<2x32xf32>
    %cst_27 = arith.constant 1.000000e+00 : f32
    %66 = vector.broadcast %cst_27 : f32 to vector<2x32xf32>
    %67 = arith.addf %66, %65 : vector<2x32xf32>
    %68 = arith.divf %66, %67 : vector<2x32xf32>
    %c0_28 = arith.constant 0 : index
    %c0_29 = arith.constant 0 : index
    %69 = vector.load %arg7[%c0_28, %c0_29] : memref<2x32xf32, #tpu.memory_space<vmem>>, vector<2x32xf32>
    %70 = arith.mulf %60, %69 : vector<2x32xf32>
    %71 = arith.mulf %54, %62 : vector<2x32xf32>
    %72 = arith.addf %70, %71 : vector<2x32xf32>
    %73 = math.tanh %72 : vector<2x32xf32>
    %74 = arith.mulf %68, %73 : vector<2x32xf32>
    %c0_30 = arith.constant 0 : index
    %c0_31 = arith.constant 0 : index
    %75 = vector.load %arg7[%c0_30, %c0_31] : memref<2x32xf32, #tpu.memory_space<vmem>>, vector<2x32xf32>
    tpu.vector_store %arg7[%c0_30, %c0_31], %72 {strides = array<i32>} : memref<2x32xf32, #tpu.memory_space<vmem>>, vector<2x32xf32>,
    %c0_32 = arith.constant 0 : index
    %c0_33 = arith.constant 0 : index
    %76 = vector.load %arg6[%c0_32, %c0_33] : memref<2x32xf32, #tpu.memory_space<vmem>>, vector<2x32xf32>
    tpu.vector_store %arg6[%c0_32, %c0_33], %74 {strides = array<i32>} : memref<2x32xf32, #tpu.memory_space<vmem>>, vector<2x32xf32>,
    %77 = arith.index_cast %c1_i32 : i32 to index
    %c0_34 = arith.constant 0 : index
    %c0_35 = arith.constant 0 : index
    %78 = vector.load %arg4[%77, %c0_34, %c0_35] : memref<8x2x32xf32, #tpu.memory_space<vmem>>, vector<1x2x32xf32>
    %79 = vector.shape_cast %78 : vector<1x2x32xf32> to vector<2x32xf32>
    %80 = vector.shape_cast %74 : vector<2x32xf32> to vector<1x2x32xf32>
    tpu.vector_store %arg4[%77, %c0_34, %c0_35], %80 {strides = array<i32>} : memref<8x2x32xf32, #tpu.memory_space<vmem>>, vector<1x2x32xf32>,
    %c2_i32 = arith.constant 2 : i32
    %81 = arith.index_cast %c2_i32 : i32 to index
    %c0_36 = arith.constant 0 : index
    %c0_37 = arith.constant 0 : index
    %82 = vector.load %arg2[%81, %c0_36, %c0_37] : memref<8x2x128xf32, #tpu.memory_space<vmem>>, vector<1x2x128xf32>
    %83 = vector.shape_cast %82 : vector<1x2x128xf32> to vector<2x128xf32>
    %c0_38 = arith.constant 0 : index
    %c0_39 = arith.constant 0 : index
    %84 = vector.load %arg6[%c0_38, %c0_39] : memref<2x32xf32, #tpu.memory_space<vmem>>, vector<2x32xf32>
    %c0_40 = arith.constant 0 : index
    %c0_41 = arith.constant 0 : index
    %85 = vector.load %arg3[%c0_40, %c0_41] : memref<32x128xf32, #tpu.memory_space<vmem>>, vector<32x128xf32>
    %cst_42 = arith.constant dense<0.000000e+00> : vector<2x128xf32>
    %86 = tpu.matmul %84, %85, %cst_42 {dimension_numbers = #tpu.dot_dimension_numbers<[1], [0], [0], [1], [0, 0, 1, 1], [], []>} : vector<2x32xf32>, vector<32x128xf32>, vector<2x128xf32> -> vector<2x128xf32>
    %87 = arith.addf %83, %86 : vector<2x128xf32>
    %88 = vector.extract_strided_slice %87 {offsets = [0, 0], sizes = [2, 32], strides = [1, 1]} : vector<2x128xf32> to vector<2x32xf32>
    %89 = arith.negf %88 : vector<2x32xf32>
    %90 = math.exp %89 : vector<2x32xf32>
    %cst_43 = arith.constant 1.000000e+00 : f32
    %91 = vector.broadcast %cst_43 : f32 to vector<2x32xf32>
    %92 = arith.addf %91, %90 : vector<2x32xf32>
    %93 = arith.divf %91, %92 : vector<2x32xf32>
    %94 = vector.extract_strided_slice %87 {offsets = [0, 32], sizes = [2, 32], strides = [1, 1]} : vector<2x128xf32> to vector<2x32xf32>
    %95 = arith.negf %94 : vector<2x32xf32>
    %96 = math.exp %95 : vector<2x32xf32>
    %cst_44 = arith.constant 1.000000e+00 : f32
    %97 = vector.broadcast %cst_44 : f32 to vector<2x32xf32>
    %98 = arith.addf %97, %96 : vector<2x32xf32>
    %99 = arith.divf %97, %98 : vector<2x32xf32>
    %100 = vector.extract_strided_slice %87 {offsets = [0, 64], sizes = [2, 32], strides = [1, 1]} : vector<2x128xf32> to vector<2x32xf32>
    %101 = math.tanh %100 : vector<2x32xf32>
    %102 = vector.extract_strided_slice %87 {offsets = [0, 96], sizes = [2, 32], strides = [1, 1]} : vector<2x128xf32> to vector<2x32xf32>
    %103 = arith.negf %102 : vector<2x32xf32>
    %104 = math.exp %103 : vector<2x32xf32>
    %cst_45 = arith.constant 1.000000e+00 : f32
    %105 = vector.broadcast %cst_45 : f32 to vector<2x32xf32>
    %106 = arith.addf %105, %104 : vector<2x32xf32>
    %107 = arith.divf %105, %106 : vector<2x32xf32>
    %c0_46 = arith.constant 0 : index
    %c0_47 = arith.constant 0 : index
    %108 = vector.load %arg7[%c0_46, %c0_47] : memref<2x32xf32, #tpu.memory_space<vmem>>, vector<2x32xf32>
    %109 = arith.mulf %99, %108 : vector<2x32xf32>
    %110 = arith.mulf %93, %101 : vector<2x32xf32>
    %111 = arith.addf %109, %110 : vector<2x32xf32>
    %112 = math.tanh %111 : vector<2x32xf32>
    %113 = arith.mulf %107, %112 : vector<2x32xf32>
    %c0_48 = arith.constant 0 : index
    %c0_49 = arith.constant 0 : index
    %114 = vector.load %arg7[%c0_48, %c0_49] : memref<2x32xf32, #tpu.memory_space<vmem>>, vector<2x32xf32>
    tpu.vector_store %arg7[%c0_48, %c0_49], %111 {strides = array<i32>} : memref<2x32xf32, #tpu.memory_space<vmem>>, vector<2x32xf32>,
    %c0_50 = arith.constant 0 : index
    %c0_51 = arith.constant 0 : index
    %115 = vector.load %arg6[%c0_50, %c0_51] : memref<2x32xf32, #tpu.memory_space<vmem>>, vector<2x32xf32>
    tpu.vector_store %arg6[%c0_50, %c0_51], %113 {strides = array<i32>} : memref<2x32xf32, #tpu.memory_space<vmem>>, vector<2x32xf32>,
    %116 = arith.index_cast %c2_i32 : i32 to index
    %c0_52 = arith.constant 0 : index
    %c0_53 = arith.constant 0 : index
    %117 = vector.load %arg4[%116, %c0_52, %c0_53] : memref<8x2x32xf32, #tpu.memory_space<vmem>>, vector<1x2x32xf32>
    %118 = vector.shape_cast %117 : vector<1x2x32xf32> to vector<2x32xf32>
    %119 = vector.shape_cast %113 : vector<2x32xf32> to vector<1x2x32xf32>
    tpu.vector_store %arg4[%116, %c0_52, %c0_53], %119 {strides = array<i32>} : memref<8x2x32xf32, #tpu.memory_space<vmem>>, vector<1x2x32xf32>,
    %c3_i32 = arith.constant 3 : i32
    %120 = arith.index_cast %c3_i32 : i32 to index
    %c0_54 = arith.constant 0 : index
    %c0_55 = arith.constant 0 : index
    %121 = vector.load %arg2[%120, %c0_54, %c0_55] : memref<8x2x128xf32, #tpu.memory_space<vmem>>, vector<1x2x128xf32>
    %122 = vector.shape_cast %121 : vector<1x2x128xf32> to vector<2x128xf32>
    %c0_56 = arith.constant 0 : index
    %c0_57 = arith.constant 0 : index
    %123 = vector.load %arg6[%c0_56, %c0_57] : memref<2x32xf32, #tpu.memory_space<vmem>>, vector<2x32xf32>
    %c0_58 = arith.constant 0 : index
    %c0_59 = arith.constant 0 : index
    %124 = vector.load %arg3[%c0_58, %c0_59] : memref<32x128xf32, #tpu.memory_space<vmem>>, vector<32x128xf32>
    %cst_60 = arith.constant dense<0.000000e+00> : vector<2x128xf32>
    %125 = tpu.matmul %123, %124, %cst_60 {dimension_numbers = #tpu.dot_dimension_numbers<[1], [0], [0], [1], [0, 0, 1, 1], [], []>} : vector<2x32xf32>, vector<32x128xf32>, vector<2x128xf32> -> vector<2x128xf32>
    %126 = arith.addf %122, %125 : vector<2x128xf32>
    %127 = vector.extract_strided_slice %126 {offsets = [0, 0], sizes = [2, 32], strides = [1, 1]} : vector<2x128xf32> to vector<2x32xf32>
    %128 = arith.negf %127 : vector<2x32xf32>
    %129 = math.exp %128 : vector<2x32xf32>
    %cst_61 = arith.constant 1.000000e+00 : f32
    %130 = vector.broadcast %cst_61 : f32 to vector<2x32xf32>
    %131 = arith.addf %130, %129 : vector<2x32xf32>
    %132 = arith.divf %130, %131 : vector<2x32xf32>
    %133 = vector.extract_strided_slice %126 {offsets = [0, 32], sizes = [2, 32], strides = [1, 1]} : vector<2x128xf32> to vector<2x32xf32>
    %134 = arith.negf %133 : vector<2x32xf32>
    %135 = math.exp %134 : vector<2x32xf32>
    %cst_62 = arith.constant 1.000000e+00 : f32
    %136 = vector.broadcast %cst_62 : f32 to vector<2x32xf32>
    %137 = arith.addf %136, %135 : vector<2x32xf32>
    %138 = arith.divf %136, %137 : vector<2x32xf32>
    %139 = vector.extract_strided_slice %126 {offsets = [0, 64], sizes = [2, 32], strides = [1, 1]} : vector<2x128xf32> to vector<2x32xf32>
    %140 = math.tanh %139 : vector<2x32xf32>
    %141 = vector.extract_strided_slice %126 {offsets = [0, 96], sizes = [2, 32], strides = [1, 1]} : vector<2x128xf32> to vector<2x32xf32>
    %142 = arith.negf %141 : vector<2x32xf32>
    %143 = math.exp %142 : vector<2x32xf32>
    %cst_63 = arith.constant 1.000000e+00 : f32
    %144 = vector.broadcast %cst_63 : f32 to vector<2x32xf32>
    %145 = arith.addf %144, %143 : vector<2x32xf32>
    %146 = arith.divf %144, %145 : vector<2x32xf32>
    %c0_64 = arith.constant 0 : index
    %c0_65 = arith.constant 0 : index
    %147 = vector.load %arg7[%c0_64, %c0_65] : memref<2x32xf32, #tpu.memory_space<vmem>>, vector<2x32xf32>
    %148 = arith.mulf %138, %147 : vector<2x32xf32>
    %149 = arith.mulf %132, %140 : vector<2x32xf32>
    %150 = arith.addf %148, %149 : vector<2x32xf32>
    %151 = math.tanh %150 : vector<2x32xf32>
    %152 = arith.mulf %146, %151 : vector<2x32xf32>
    %c0_66 = arith.constant 0 : index
    %c0_67 = arith.constant 0 : index
    %153 = vector.load %arg7[%c0_66, %c0_67] : memref<2x32xf32, #tpu.memory_space<vmem>>, vector<2x32xf32>
    tpu.vector_store %arg7[%c0_66, %c0_67], %150 {strides = array<i32>} : memref<2x32xf32, #tpu.memory_space<vmem>>, vector<2x32xf32>,
    %c0_68 = arith.constant 0 : index
    %c0_69 = arith.constant 0 : index
    %154 = vector.load %arg6[%c0_68, %c0_69] : memref<2x32xf32, #tpu.memory_space<vmem>>, vector<2x32xf32>
    tpu.vector_store %arg6[%c0_68, %c0_69], %152 {strides = array<i32>} : memref<2x32xf32, #tpu.memory_space<vmem>>, vector<2x32xf32>,
    %155 = arith.index_cast %c3_i32 : i32 to index
    %c0_70 = arith.constant 0 : index
    %c0_71 = arith.constant 0 : index
    %156 = vector.load %arg4[%155, %c0_70, %c0_71] : memref<8x2x32xf32, #tpu.memory_space<vmem>>, vector<1x2x32xf32>
    %157 = vector.shape_cast %156 : vector<1x2x32xf32> to vector<2x32xf32>
    %158 = vector.shape_cast %152 : vector<2x32xf32> to vector<1x2x32xf32>
    tpu.vector_store %arg4[%155, %c0_70, %c0_71], %158 {strides = array<i32>} : memref<8x2x32xf32, #tpu.memory_space<vmem>>, vector<1x2x32xf32>,
    %c4_i32 = arith.constant 4 : i32
    %159 = arith.index_cast %c4_i32 : i32 to index
    %c0_72 = arith.constant 0 : index
    %c0_73 = arith.constant 0 : index
    %160 = vector.load %arg2[%159, %c0_72, %c0_73] : memref<8x2x128xf32, #tpu.memory_space<vmem>>, vector<1x2x128xf32>
    %161 = vector.shape_cast %160 : vector<1x2x128xf32> to vector<2x128xf32>
    %c0_74 = arith.constant 0 : index
    %c0_75 = arith.constant 0 : index
    %162 = vector.load %arg6[%c0_74, %c0_75] : memref<2x32xf32, #tpu.memory_space<vmem>>, vector<2x32xf32>
    %c0_76 = arith.constant 0 : index
    %c0_77 = arith.constant 0 : index
    %163 = vector.load %arg3[%c0_76, %c0_77] : memref<32x128xf32, #tpu.memory_space<vmem>>, vector<32x128xf32>
    %cst_78 = arith.constant dense<0.000000e+00> : vector<2x128xf32>
    %164 = tpu.matmul %162, %163, %cst_78 {dimension_numbers = #tpu.dot_dimension_numbers<[1], [0], [0], [1], [0, 0, 1, 1], [], []>} : vector<2x32xf32>, vector<32x128xf32>, vector<2x128xf32> -> vector<2x128xf32>
    %165 = arith.addf %161, %164 : vector<2x128xf32>
    %166 = vector.extract_strided_slice %165 {offsets = [0, 0], sizes = [2, 32], strides = [1, 1]} : vector<2x128xf32> to vector<2x32xf32>
    %167 = arith.negf %166 : vector<2x32xf32>
    %168 = math.exp %167 : vector<2x32xf32>
    %cst_79 = arith.constant 1.000000e+00 : f32
    %169 = vector.broadcast %cst_79 : f32 to vector<2x32xf32>
    %170 = arith.addf %169, %168 : vector<2x32xf32>
    %171 = arith.divf %169, %170 : vector<2x32xf32>
    %172 = vector.extract_strided_slice %165 {offsets = [0, 32], sizes = [2, 32], strides = [1, 1]} : vector<2x128xf32> to vector<2x32xf32>
    %173 = arith.negf %172 : vector<2x32xf32>
    %174 = math.exp %173 : vector<2x32xf32>
    %cst_80 = arith.constant 1.000000e+00 : f32
    %175 = vector.broadcast %cst_80 : f32 to vector<2x32xf32>
    %176 = arith.addf %175, %174 : vector<2x32xf32>
    %177 = arith.divf %175, %176 : vector<2x32xf32>
    %178 = vector.extract_strided_slice %165 {offsets = [0, 64], sizes = [2, 32], strides = [1, 1]} : vector<2x128xf32> to vector<2x32xf32>
    %179 = math.tanh %178 : vector<2x32xf32>
    %180 = vector.extract_strided_slice %165 {offsets = [0, 96], sizes = [2, 32], strides = [1, 1]} : vector<2x128xf32> to vector<2x32xf32>
    %181 = arith.negf %180 : vector<2x32xf32>
    %182 = math.exp %181 : vector<2x32xf32>
    %cst_81 = arith.constant 1.000000e+00 : f32
    %183 = vector.broadcast %cst_81 : f32 to vector<2x32xf32>
    %184 = arith.addf %183, %182 : vector<2x32xf32>
    %185 = arith.divf %183, %184 : vector<2x32xf32>
    %c0_82 = arith.constant 0 : index
    %c0_83 = arith.constant 0 : index
    %186 = vector.load %arg7[%c0_82, %c0_83] : memref<2x32xf32, #tpu.memory_space<vmem>>, vector<2x32xf32>
    %187 = arith.mulf %177, %186 : vector<2x32xf32>
    %188 = arith.mulf %171, %179 : vector<2x32xf32>
    %189 = arith.addf %187, %188 : vector<2x32xf32>
    %190 = math.tanh %189 : vector<2x32xf32>
    %191 = arith.mulf %185, %190 : vector<2x32xf32>
    %c0_84 = arith.constant 0 : index
    %c0_85 = arith.constant 0 : index
    %192 = vector.load %arg7[%c0_84, %c0_85] : memref<2x32xf32, #tpu.memory_space<vmem>>, vector<2x32xf32>
    tpu.vector_store %arg7[%c0_84, %c0_85], %189 {strides = array<i32>} : memref<2x32xf32, #tpu.memory_space<vmem>>, vector<2x32xf32>,
    %c0_86 = arith.constant 0 : index
    %c0_87 = arith.constant 0 : index
    %193 = vector.load %arg6[%c0_86, %c0_87] : memref<2x32xf32, #tpu.memory_space<vmem>>, vector<2x32xf32>
    tpu.vector_store %arg6[%c0_86, %c0_87], %191 {strides = array<i32>} : memref<2x32xf32, #tpu.memory_space<vmem>>, vector<2x32xf32>,
    %194 = arith.index_cast %c4_i32 : i32 to index
    %c0_88 = arith.constant 0 : index
    %c0_89 = arith.constant 0 : index
    %195 = vector.load %arg4[%194, %c0_88, %c0_89] : memref<8x2x32xf32, #tpu.memory_space<vmem>>, vector<1x2x32xf32>
    %196 = vector.shape_cast %195 : vector<1x2x32xf32> to vector<2x32xf32>
    %197 = vector.shape_cast %191 : vector<2x32xf32> to vector<1x2x32xf32>
    tpu.vector_store %arg4[%194, %c0_88, %c0_89], %197 {strides = array<i32>} : memref<8x2x32xf32, #tpu.memory_space<vmem>>, vector<1x2x32xf32>,
    %c5_i32 = arith.constant 5 : i32
    %198 = arith.index_cast %c5_i32 : i32 to index
    %c0_90 = arith.constant 0 : index
    %c0_91 = arith.constant 0 : index
    %199 = vector.load %arg2[%198, %c0_90, %c0_91] : memref<8x2x128xf32, #tpu.memory_space<vmem>>, vector<1x2x128xf32>
    %200 = vector.shape_cast %199 : vector<1x2x128xf32> to vector<2x128xf32>
    %c0_92 = arith.constant 0 : index
    %c0_93 = arith.constant 0 : index
    %201 = vector.load %arg6[%c0_92, %c0_93] : memref<2x32xf32, #tpu.memory_space<vmem>>, vector<2x32xf32>
    %c0_94 = arith.constant 0 : index
    %c0_95 = arith.constant 0 : index
    %202 = vector.load %arg3[%c0_94, %c0_95] : memref<32x128xf32, #tpu.memory_space<vmem>>, vector<32x128xf32>
    %cst_96 = arith.constant dense<0.000000e+00> : vector<2x128xf32>
    %203 = tpu.matmul %201, %202, %cst_96 {dimension_numbers = #tpu.dot_dimension_numbers<[1], [0], [0], [1], [0, 0, 1, 1], [], []>} : vector<2x32xf32>, vector<32x128xf32>, vector<2x128xf32> -> vector<2x128xf32>
    %204 = arith.addf %200, %203 : vector<2x128xf32>
    %205 = vector.extract_strided_slice %204 {offsets = [0, 0], sizes = [2, 32], strides = [1, 1]} : vector<2x128xf32> to vector<2x32xf32>
    %206 = arith.negf %205 : vector<2x32xf32>
    %207 = math.exp %206 : vector<2x32xf32>
    %cst_97 = arith.constant 1.000000e+00 : f32
    %208 = vector.broadcast %cst_97 : f32 to vector<2x32xf32>
    %209 = arith.addf %208, %207 : vector<2x32xf32>
    %210 = arith.divf %208, %209 : vector<2x32xf32>
    %211 = vector.extract_strided_slice %204 {offsets = [0, 32], sizes = [2, 32], strides = [1, 1]} : vector<2x128xf32> to vector<2x32xf32>
    %212 = arith.negf %211 : vector<2x32xf32>
    %213 = math.exp %212 : vector<2x32xf32>
    %cst_98 = arith.constant 1.000000e+00 : f32
    %214 = vector.broadcast %cst_98 : f32 to vector<2x32xf32>
    %215 = arith.addf %214, %213 : vector<2x32xf32>
    %216 = arith.divf %214, %215 : vector<2x32xf32>
    %217 = vector.extract_strided_slice %204 {offsets = [0, 64], sizes = [2, 32], strides = [1, 1]} : vector<2x128xf32> to vector<2x32xf32>
    %218 = math.tanh %217 : vector<2x32xf32>
    %219 = vector.extract_strided_slice %204 {offsets = [0, 96], sizes = [2, 32], strides = [1, 1]} : vector<2x128xf32> to vector<2x32xf32>
    %220 = arith.negf %219 : vector<2x32xf32>
    %221 = math.exp %220 : vector<2x32xf32>
    %cst_99 = arith.constant 1.000000e+00 : f32
    %222 = vector.broadcast %cst_99 : f32 to vector<2x32xf32>
    %223 = arith.addf %222, %221 : vector<2x32xf32>
    %224 = arith.divf %222, %223 : vector<2x32xf32>
    %c0_100 = arith.constant 0 : index
    %c0_101 = arith.constant 0 : index
    %225 = vector.load %arg7[%c0_100, %c0_101] : memref<2x32xf32, #tpu.memory_space<vmem>>, vector<2x32xf32>
    %226 = arith.mulf %216, %225 : vector<2x32xf32>
    %227 = arith.mulf %210, %218 : vector<2x32xf32>
    %228 = arith.addf %226, %227 : vector<2x32xf32>
    %229 = math.tanh %228 : vector<2x32xf32>
    %230 = arith.mulf %224, %229 : vector<2x32xf32>
    %c0_102 = arith.constant 0 : index
    %c0_103 = arith.constant 0 : index
    %231 = vector.load %arg7[%c0_102, %c0_103] : memref<2x32xf32, #tpu.memory_space<vmem>>, vector<2x32xf32>
    tpu.vector_store %arg7[%c0_102, %c0_103], %228 {strides = array<i32>} : memref<2x32xf32, #tpu.memory_space<vmem>>, vector<2x32xf32>,
    %c0_104 = arith.constant 0 : index
    %c0_105 = arith.constant 0 : index
    %232 = vector.load %arg6[%c0_104, %c0_105] : memref<2x32xf32, #tpu.memory_space<vmem>>, vector<2x32xf32>
    tpu.vector_store %arg6[%c0_104, %c0_105], %230 {strides = array<i32>} : memref<2x32xf32, #tpu.memory_space<vmem>>, vector<2x32xf32>,
    %233 = arith.index_cast %c5_i32 : i32 to index
    %c0_106 = arith.constant 0 : index
    %c0_107 = arith.constant 0 : index
    %234 = vector.load %arg4[%233, %c0_106, %c0_107] : memref<8x2x32xf32, #tpu.memory_space<vmem>>, vector<1x2x32xf32>
    %235 = vector.shape_cast %234 : vector<1x2x32xf32> to vector<2x32xf32>
    %236 = vector.shape_cast %230 : vector<2x32xf32> to vector<1x2x32xf32>
    tpu.vector_store %arg4[%233, %c0_106, %c0_107], %236 {strides = array<i32>} : memref<8x2x32xf32, #tpu.memory_space<vmem>>, vector<1x2x32xf32>,
    %c6_i32 = arith.constant 6 : i32
    %237 = arith.index_cast %c6_i32 : i32 to index
    %c0_108 = arith.constant 0 : index
    %c0_109 = arith.constant 0 : index
    %238 = vector.load %arg2[%237, %c0_108, %c0_109] : memref<8x2x128xf32, #tpu.memory_space<vmem>>, vector<1x2x128xf32>
    %239 = vector.shape_cast %238 : vector<1x2x128xf32> to vector<2x128xf32>
    %c0_110 = arith.constant 0 : index
    %c0_111 = arith.constant 0 : index
    %240 = vector.load %arg6[%c0_110, %c0_111] : memref<2x32xf32, #tpu.memory_space<vmem>>, vector<2x32xf32>
    %c0_112 = arith.constant 0 : index
    %c0_113 = arith.constant 0 : index
    %241 = vector.load %arg3[%c0_112, %c0_113] : memref<32x128xf32, #tpu.memory_space<vmem>>, vector<32x128xf32>
    %cst_114 = arith.constant dense<0.000000e+00> : vector<2x128xf32>
    %242 = tpu.matmul %240, %241, %cst_114 {dimension_numbers = #tpu.dot_dimension_numbers<[1], [0], [0], [1], [0, 0, 1, 1], [], []>} : vector<2x32xf32>, vector<32x128xf32>, vector<2x128xf32> -> vector<2x128xf32>
    %243 = arith.addf %239, %242 : vector<2x128xf32>
    %244 = vector.extract_strided_slice %243 {offsets = [0, 0], sizes = [2, 32], strides = [1, 1]} : vector<2x128xf32> to vector<2x32xf32>
    %245 = arith.negf %244 : vector<2x32xf32>
    %246 = math.exp %245 : vector<2x32xf32>
    %cst_115 = arith.constant 1.000000e+00 : f32
    %247 = vector.broadcast %cst_115 : f32 to vector<2x32xf32>
    %248 = arith.addf %247, %246 : vector<2x32xf32>
    %249 = arith.divf %247, %248 : vector<2x32xf32>
    %250 = vector.extract_strided_slice %243 {offsets = [0, 32], sizes = [2, 32], strides = [1, 1]} : vector<2x128xf32> to vector<2x32xf32>
    %251 = arith.negf %250 : vector<2x32xf32>
    %252 = math.exp %251 : vector<2x32xf32>
    %cst_116 = arith.constant 1.000000e+00 : f32
    %253 = vector.broadcast %cst_116 : f32 to vector<2x32xf32>
    %254 = arith.addf %253, %252 : vector<2x32xf32>
    %255 = arith.divf %253, %254 : vector<2x32xf32>
    %256 = vector.extract_strided_slice %243 {offsets = [0, 64], sizes = [2, 32], strides = [1, 1]} : vector<2x128xf32> to vector<2x32xf32>
    %257 = math.tanh %256 : vector<2x32xf32>
    %258 = vector.extract_strided_slice %243 {offsets = [0, 96], sizes = [2, 32], strides = [1, 1]} : vector<2x128xf32> to vector<2x32xf32>
    %259 = arith.negf %258 : vector<2x32xf32>
    %260 = math.exp %259 : vector<2x32xf32>
    %cst_117 = arith.constant 1.000000e+00 : f32
    %261 = vector.broadcast %cst_117 : f32 to vector<2x32xf32>
    %262 = arith.addf %261, %260 : vector<2x32xf32>
    %263 = arith.divf %261, %262 : vector<2x32xf32>
    %c0_118 = arith.constant 0 : index
    %c0_119 = arith.constant 0 : index
    %264 = vector.load %arg7[%c0_118, %c0_119] : memref<2x32xf32, #tpu.memory_space<vmem>>, vector<2x32xf32>
    %265 = arith.mulf %255, %264 : vector<2x32xf32>
    %266 = arith.mulf %249, %257 : vector<2x32xf32>
    %267 = arith.addf %265, %266 : vector<2x32xf32>
    %268 = math.tanh %267 : vector<2x32xf32>
    %269 = arith.mulf %263, %268 : vector<2x32xf32>
    %c0_120 = arith.constant 0 : index
    %c0_121 = arith.constant 0 : index
    %270 = vector.load %arg7[%c0_120, %c0_121] : memref<2x32xf32, #tpu.memory_space<vmem>>, vector<2x32xf32>
    tpu.vector_store %arg7[%c0_120, %c0_121], %267 {strides = array<i32>} : memref<2x32xf32, #tpu.memory_space<vmem>>, vector<2x32xf32>,
    %c0_122 = arith.constant 0 : index
    %c0_123 = arith.constant 0 : index
    %271 = vector.load %arg6[%c0_122, %c0_123] : memref<2x32xf32, #tpu.memory_space<vmem>>, vector<2x32xf32>
    tpu.vector_store %arg6[%c0_122, %c0_123], %269 {strides = array<i32>} : memref<2x32xf32, #tpu.memory_space<vmem>>, vector<2x32xf32>,
    %272 = arith.index_cast %c6_i32 : i32 to index
    %c0_124 = arith.constant 0 : index
    %c0_125 = arith.constant 0 : index
    %273 = vector.load %arg4[%272, %c0_124, %c0_125] : memref<8x2x32xf32, #tpu.memory_space<vmem>>, vector<1x2x32xf32>
    %274 = vector.shape_cast %273 : vector<1x2x32xf32> to vector<2x32xf32>
    %275 = vector.shape_cast %269 : vector<2x32xf32> to vector<1x2x32xf32>
    tpu.vector_store %arg4[%272, %c0_124, %c0_125], %275 {strides = array<i32>} : memref<8x2x32xf32, #tpu.memory_space<vmem>>, vector<1x2x32xf32>,
    %c7_i32 = arith.constant 7 : i32
    %276 = arith.index_cast %c7_i32 : i32 to index
    %c0_126 = arith.constant 0 : index
    %c0_127 = arith.constant 0 : index
    %277 = vector.load %arg2[%276, %c0_126, %c0_127] : memref<8x2x128xf32, #tpu.memory_space<vmem>>, vector<1x2x128xf32>
    %278 = vector.shape_cast %277 : vector<1x2x128xf32> to vector<2x128xf32>
    %c0_128 = arith.constant 0 : index
    %c0_129 = arith.constant 0 : index
    %279 = vector.load %arg6[%c0_128, %c0_129] : memref<2x32xf32, #tpu.memory_space<vmem>>, vector<2x32xf32>
    %c0_130 = arith.constant 0 : index
    %c0_131 = arith.constant 0 : index
    %280 = vector.load %arg3[%c0_130, %c0_131] : memref<32x128xf32, #tpu.memory_space<vmem>>, vector<32x128xf32>
    %cst_132 = arith.constant dense<0.000000e+00> : vector<2x128xf32>
    %281 = tpu.matmul %279, %280, %cst_132 {dimension_numbers = #tpu.dot_dimension_numbers<[1], [0], [0], [1], [0, 0, 1, 1], [], []>} : vector<2x32xf32>, vector<32x128xf32>, vector<2x128xf32> -> vector<2x128xf32>
    %282 = arith.addf %278, %281 : vector<2x128xf32>
    %283 = vector.extract_strided_slice %282 {offsets = [0, 0], sizes = [2, 32], strides = [1, 1]} : vector<2x128xf32> to vector<2x32xf32>
    %284 = arith.negf %283 : vector<2x32xf32>
    %285 = math.exp %284 : vector<2x32xf32>
    %cst_133 = arith.constant 1.000000e+00 : f32
    %286 = vector.broadcast %cst_133 : f32 to vector<2x32xf32>
    %287 = arith.addf %286, %285 : vector<2x32xf32>
    %288 = arith.divf %286, %287 : vector<2x32xf32>
    %289 = vector.extract_strided_slice %282 {offsets = [0, 32], sizes = [2, 32], strides = [1, 1]} : vector<2x128xf32> to vector<2x32xf32>
    %290 = arith.negf %289 : vector<2x32xf32>
    %291 = math.exp %290 : vector<2x32xf32>
    %cst_134 = arith.constant 1.000000e+00 : f32
    %292 = vector.broadcast %cst_134 : f32 to vector<2x32xf32>
    %293 = arith.addf %292, %291 : vector<2x32xf32>
    %294 = arith.divf %292, %293 : vector<2x32xf32>
    %295 = vector.extract_strided_slice %282 {offsets = [0, 64], sizes = [2, 32], strides = [1, 1]} : vector<2x128xf32> to vector<2x32xf32>
    %296 = math.tanh %295 : vector<2x32xf32>
    %297 = vector.extract_strided_slice %282 {offsets = [0, 96], sizes = [2, 32], strides = [1, 1]} : vector<2x128xf32> to vector<2x32xf32>
    %298 = arith.negf %297 : vector<2x32xf32>
    %299 = math.exp %298 : vector<2x32xf32>
    %cst_135 = arith.constant 1.000000e+00 : f32
    %300 = vector.broadcast %cst_135 : f32 to vector<2x32xf32>
    %301 = arith.addf %300, %299 : vector<2x32xf32>
    %302 = arith.divf %300, %301 : vector<2x32xf32>
    %c0_136 = arith.constant 0 : index
    %c0_137 = arith.constant 0 : index
    %303 = vector.load %arg7[%c0_136, %c0_137] : memref<2x32xf32, #tpu.memory_space<vmem>>, vector<2x32xf32>
    %304 = arith.mulf %294, %303 : vector<2x32xf32>
    %305 = arith.mulf %288, %296 : vector<2x32xf32>
    %306 = arith.addf %304, %305 : vector<2x32xf32>
    %307 = math.tanh %306 : vector<2x32xf32>
    %308 = arith.mulf %302, %307 : vector<2x32xf32>
    %c0_138 = arith.constant 0 : index
    %c0_139 = arith.constant 0 : index
    %309 = vector.load %arg7[%c0_138, %c0_139] : memref<2x32xf32, #tpu.memory_space<vmem>>, vector<2x32xf32>
    tpu.vector_store %arg7[%c0_138, %c0_139], %306 {strides = array<i32>} : memref<2x32xf32, #tpu.memory_space<vmem>>, vector<2x32xf32>,
    %c0_140 = arith.constant 0 : index
    %c0_141 = arith.constant 0 : index
    %310 = vector.load %arg6[%c0_140, %c0_141] : memref<2x32xf32, #tpu.memory_space<vmem>>, vector<2x32xf32>
    tpu.vector_store %arg6[%c0_140, %c0_141], %308 {strides = array<i32>} : memref<2x32xf32, #tpu.memory_space<vmem>>, vector<2x32xf32>,
    %311 = arith.index_cast %c7_i32 : i32 to index
    %c0_142 = arith.constant 0 : index
    %c0_143 = arith.constant 0 : index
    %312 = vector.load %arg4[%311, %c0_142, %c0_143] : memref<8x2x32xf32, #tpu.memory_space<vmem>>, vector<1x2x32xf32>
    %313 = vector.shape_cast %312 : vector<1x2x32xf32> to vector<2x32xf32>
    %314 = vector.shape_cast %308 : vector<2x32xf32> to vector<1x2x32xf32>
    tpu.vector_store %arg4[%311, %c0_142, %c0_143], %314 {strides = array<i32>} : memref<8x2x32xf32, #tpu.memory_space<vmem>>, vector<1x2x32xf32>,
    %c8_i32 = arith.constant 8 : i32
    %c0_i32_144 = arith.constant 0 : i32
    %315 = arith.cmpi eq, %arg1, %c0_i32_144 : i32
    %316 = arith.extui %315 : i1 to i32
    %c0_i32_145 = arith.constant 0 : i32
    %317 = arith.cmpi ne, %316, %c0_i32_145 : i32
    scf.if %317 {
      %c0_146 = arith.constant 0 : index
      %c0_147 = arith.constant 0 : index
      %318 = vector.load %arg7[%c0_146, %c0_147] : memref<2x32xf32, #tpu.memory_space<vmem>>, vector<2x32xf32>
      %c0_148 = arith.constant 0 : index
      %c0_149 = arith.constant 0 : index
      %319 = vector.load %arg5[%c0_148, %c0_149] : memref<2x32xf32, #tpu.memory_space<vmem>>, vector<2x32xf32>
      tpu.vector_store %arg5[%c0_148, %c0_149], %318 {strides = array<i32>} : memref<2x32xf32, #tpu.memory_space<vmem>>, vector<2x32xf32>,
    } else {
    }
    return
  }
  func.func @transform_0(%arg0: i32, %arg1: i32) -> (i32, i32, i32) {
    %c0_i32 = arith.constant 0 : i32
    %c0_i32_0 = arith.constant 0 : i32
    return %arg1, %arg0, %c0_i32 : i32, i32, i32
  }
  func.func @transform_1(%arg0: i32, %arg1: i32) -> (i32, i32) {
    %c0_i32 = arith.constant 0 : i32
    %c0_i32_0 = arith.constant 0 : i32
    %c0_i32_1 = arith.constant 0 : i32
    return %c0_i32, %c0_i32_0 : i32, i32
  }
  func.func @transform_2(%arg0: i32, %arg1: i32) -> (i32, i32, i32) {
    %c0_i32 = arith.constant 0 : i32
    %c0_i32_0 = arith.constant 0 : i32
    return %arg1, %arg0, %c0_i32 : i32, i32, i32
  }
  func.func @transform_3(%arg0: i32, %arg1: i32) -> (i32, i32) {
    %c0_i32 = arith.constant 0 : i32
    %c0_i32_0 = arith.constant 0 : i32
    return %arg0, %c0_i32 : i32, i32
  }
}

</mosaic_0001>

<bundles_post_ra>
// kernel: word_rnn_forward.3
= control target key start
LH: loop header
LB: loop body
LE: loop exit
PB: predicated region body
PF: predicated region fallthrough
CT: control target
= control target key end

     0   :  { %vm25_vm0 = vcmask 130048   ;;  %s172_s1 = inlined_call_operand.vmem [shape: f32[16,128], index: 1, kind: input, shape index: {}]   ;;  %s173_s0 = inlined_call_operand.vmem [shape: f32[16,16], index: 0, kind: input, shape index: {}]   ;;  %s174_s2 = inlined_call_operand.vmem [shape: f32[1,128], index: 2, kind: input, shape index: {}]   ;;  %s175_s3 = inlined_call_operand.vmem [shape: f32[16,128], index: 3, kind: output, shape index: {}]  }
   0x1   :  { %v16_v0 = vld [vmem:[%s172_s1] sm:$0xff]  ;;  %v17_v1 = vld [vmem:[%s172_s1 + $0x8] sm:$0xff] }
   0x2   :  { %v14_v2 = vld [vmem:[%s173_s0] sm:$0xff]  ;;  %v127_v3 = vpack.c.bf16 %v17_v1, %v16_v0  ;;  %v15_v4 = vld [vmem:[%s173_s0 + $0x8] sm:$0xff] }
   0x3   :  { %124 = vmatprep.mubr.msk.f32.mxu0 %vm25_vm0, %v14_v2  ;;  %v113_v5 = vld [vmem:[%s174_s2] ss:$0 sm:$0xff] }
   0x4   :  { %128 = vmatprep.subr.bf16.mxu0 %v127_v3 }
   0x5   :  { %130 = vmatpush3.bf16.msra.mxu0 %v127_v3 }
   0x8   :  { %125 = vmatmul.mubr.msk.f32.vlgmr.msra.gmra.mrb[0].mxu0 %vm25_vm0, %v15_v4 }
  0xdb   :  { %v126_v6 = vpop.f32.mrb[0].mxu0 }
  0xdc   :  { %v104_v7 = vadd.f32 %v126_v6, %v113_v5  ;;  %v98_v8 = vpop.f32.mrb[1].mxu0 }
  0xdd   :  { %v99_v9 = vadd.f32 %v113_v5, %v98_v8 }
  0xde   :  { %108 = vst [vmem:[%s175_s3 + $0x8] sm:$0xff] %v104_v7 }
  0xdf   :  { %107 = vst [vmem:[%s175_s3] sm:$0xff] %v99_v9 }

// kernel: word_rnn_forward.5
= control target key start
LH: loop header
LB: loop body
LE: loop exit
PB: predicated region body
PF: predicated region fallthrough
CT: control target
= control target key end

     0   :  { %vm28_vm0 = vcmask 261120   ;;  %s243_s0 = inlined_call_operand.vmem [shape: f32[16,32], index: 0, kind: input, shape index: {}]   ;;  %s244_s1 = inlined_call_operand.vmem [shape: f32[32,32], index: 1, kind: input, shape index: {}]   ;;  %s245_s2 = inlined_call_operand.vmem [shape: f32[1,32], index: 2, kind: input, shape index: {}]   ;;  %s246_s3 = inlined_call_operand.hbm [shape: f32[16,32], index: 3, kind: output, shape index: {}]  }
   0x1   :  { %v17_v0 = vld [vmem:[%s244_s1] sm:$0xff]  ;;  %v18_v1 = vld [vmem:[%s244_s1 + $0x8] sm:$0xff]  ;;  %v19_v2 = vld [vmem:[%s244_s1 + $0x10] sm:$0xff] }
   0x2   :  { %v148_v3 = vpack.c.bf16 %v18_v1, %v17_v0  ;;  %v20_v4 = vld [vmem:[%s244_s1 + $0x18] sm:$0xff]  ;;  %v15_v5 = vld [vmem:[%s243_s0] sm:$0xff] }
   0x3   :  { %v152_v6 = vpack.c.bf16 %v20_v4, %v19_v2  ;;  %145 = vmatprep.mubr.msk.f32.mxu0 %vm28_vm0, %v15_v5 }
   0x4   :  { %8 = vsyncpa [#allocation3], 0  ;;  %149 = vmatprep.subr.bf16.mxu0 %v148_v3  ;;  %v16_v7 = vld [vmem:[%s243_s0 + $0x8] sm:$0xff]  ;;  %v128_v8 = vld [vmem:[%s245_s2] ss:$0 sm:$0xff]  ;;  %s183_s25 = smov [#allocation2]  }
   0x5   :  { %151 = vmatpush3.bf16.msra.mxu0 %v148_v3  ;;  %s117_s26 = sshll.u32 %s183_s25, 4  ;;  %s118_s26 = int_to_ptr.vmem [resolvable:$true] %s117_s26 }
   0x6   :  { %153 = vmatprep.subr.bf16.mxu0 %v152_v6  ;;  %s159_s27 = scalar_lea.vmem %s118_s26, 256  ;;  %p164_p1 = scmp.lt.s32.totalorder %s118_s26, %s118_s26 }
   0x7   :  { %p160_p0 = scmp.ne.s32.totalorder %s118_s26, %s159_s27  ;;  %p165_p2 = scmp.lt.s32.totalorder %s159_s27, %s159_s27 }
   0x9   :  { %155 = vmatpush3.bf16.msra.mxu0 %v152_v6  ;;  %p166_p3 = por %p165_p2, %p164_p1 }
   0xb   :  { %p167_p4 = pnand %p166_p3, %p160_p0 }
   0xc   :  { %146 = vmatmul.mubr.msk.f32.vlgmr.msra.gmra.mrb[0].mxu0 %vm28_vm0, %v16_v7 }
  0xdf   :  { %v147_v9 = vpop.f32.mrb[0].mxu0 }
  0xe0   :  { %v107_v10 = vadd.f32 %v147_v9, %v128_v8  ;;  %v101_v11 = vpop.f32.mrb[1].mxu0 }
  0xe1   :  { %v102_v12 = vadd.f32 %v128_v8, %v101_v11 }
  0xe2   :  { %111 = vst.msk [vmem:[#allocation2 + $0x8] sm:$0xff] %vm28_vm0, %v107_v10 }
  0xe3   :  { %110 = vst.msk [vmem:[#allocation2] sm:$0xff] %vm28_vm0, %v102_v12 }
  0xe4   :  { %170 = shalt.err (!%p167_p4)
}
  0xe5   :  { %s171_s28 = scalar_lea.hbm %s246_s3, 256 }
  0xe6   :  { %p172_p5 = scmp.ne.s32.totalorder %s246_s3, %s171_s28  ;;  %p175_p6 = scmp.lt.u32.totalorder %s171_s28, %s246_s3 }
  0xe8   :  { %p177_p7 = pnand %p175_p6, %p172_p5 }
  0xea   :  { %180 = shalt.err (!%p177_p7)
}
  0xeb   :  { %s184_s6 = smov 128   ;;  %s185_s7 = smov 8  }
  0xec   :  { %123 = dma.vmem_to_hbm [thread:$0]  %s118_s26, 256, %s246_s3, [#allocation3], %s184_s6, %s184_s6, %s185_s7  }
  0xed   :  { %181 = dma.done.wait [#allocation3], 256  }
  0xee   :  { %182 = vsyncadd [#allocation3], 4294967040 }
  0xef   :  { %127 = vsyncpa [#allocation3], 1 }

// kernel: word_rnn_forward.4
= control target key start
LH: loop header
LB: loop body
LE: loop exit
PB: predicated region body
PF: predicated region fallthrough
CT: control target
= control target key end

     0   :  { %vm18_vm0 = vcmask 254976   ;;  %v1321_v3 = vmov 0.0|0.0   ;;  %v1322_v6 = vmov 0.0   ;;  %vm1323_vm1 = vmmov 0   ;;  %s1557_s0 = inlined_call_operand.vmem [shape: f32[8,2,128], index: 0, kind: input, shape index: {}]   ;;  %s1558_s1 = inlined_call_operand.vmem [shape: f32[32,128], index: 1, kind: input, shape index: {}]   ;;  %s1559_s2 = inlined_call_operand.vmem [shape: f32[8,2,32], index: 2, kind: output, shape index: {0}]   ;;  %s1560_s3 = inlined_call_operand.hbm [shape: f32[2,32], index: 3, kind: output, shape index: {1}]  }
   0x1   :  { %v23_v0 = vld [vmem:[%s1558_s1] sm:$0xff]  ;;  %v24_v1 = vld [vmem:[%s1558_s1 + $0x8] sm:$0xff]  ;;  %v25_v2 = vld [vmem:[%s1558_s1 + $0x10] sm:$0xff]  ;;  %1178 = vmatprep.subr.bf16.mxu0 %v1321_v3  ;;  %19 = vst.msk [vmem:[#allocation2] sm:$0x3] %vm18_vm0, %v1322_v6  ;;  %1184 = vmatprep.subr.bf16.mxu1 %v1321_v3 }
   0x2   :  { %v1358_v4 = vpack.c.bf16 %v24_v1, %v23_v0  ;;  %v26_v5 = vld [vmem:[%s1558_s1 + $0x18] sm:$0xff]  ;;  %20 = vst.msk [vmem:[#allocation3] sm:$0x3] %vm18_vm0, %v1322_v6  ;;  %1098 = vmatprep.mubr.msk.f32.mxu0 %vm1323_vm1, %v1322_v6  ;;  %1109 = vmatprep.mubr.msk.f32.mxu1 %vm1323_vm1, %v1322_v6 }
   0x3   :  { %9 = vsyncpa [#allocation5], 0  ;;  %v1373_v7 = vpack.c.bf16 %v26_v5, %v25_v2  ;;  %vm27_vm2 = vcmask 261120   ;;  %v21_v9 = vld [vmem:[%s1557_s0] sm:$0x3]  ;;  %s1324_s21 = smov 64  }
   0x4   :  { %1180 = vmatpush3.bf16.msra.mxu0 %v1358_v4  ;;  %1186 = vmatpush3.bf16.msra.mxu1 %v1358_v4  ;;  %s1325_s22 = smov 32   ;;  %s1326_s23 = smov 96   ;;  %v1022_v32 = vld [vmem:[%s1557_s0 + $0x2] sm:$0x3]  ;;  %v1026_v54 = vld [vmem:[%s1557_s0 + $0x4] sm:$0x3] }
   0x5   :  { %1181 = vmatprep.subr.bf16.mxu0 %v1321_v3  ;;  %1187 = vmatprep.subr.bf16.mxu1 %v1321_v3 }
   0x8   :  { %1183 = vmatpush3.bf16.msra.mxu0 %v1373_v7  ;;  %1189 = vmatpush3.bf16.msra.mxu1 %v1373_v7  ;;  %v22_v8 = vld [vmem:[#allocation2] sm:$0x3] }
   0x9   :  { %1190 = vmatprep.subr.bf16.mxu0 %v1321_v3  ;;  %1196 = vmatprep.subr.bf16.mxu1 %v1321_v3  ;;  %v109_v14 = vld [vmem:[#allocation3] sm:$0x3] }
   0xb   :  { %1099 = vmatmul.mubr.msk.f32.vlgmr.msra.gmra.mrb[0].mxu0 %vm27_vm2, %v22_v8 }
   0xc   :  { %1192 = vmatpush3.bf16.msra.mxu0 %v1358_v4  ;;  %1120 = vmatprep.mubr.msk.f32.mxu0 %vm1323_vm1, %v1322_v6 }
   0xd   :  { %1193 = vmatprep.subr.bf16.mxu0 %v1321_v3 }
  0x10   :  { %1195 = vmatpush3.bf16.msra.mxu0 %v1373_v7 }
  0x11   :  { %1202 = vmatprep.subr.bf16.mxu0 %v1321_v3 }
  0xde   :  { %v97_v10 = vpop.f32.mrb[0].mxu0 }
  0xdf   :  { %v101_v11 = vadd.f32 %v97_v10, %v21_v9  ;;  %v1100_v12 = vpop.f32.mrb[1].mxu0 }
  0xe1   :  { %1233 = vtanh.f32 %v101_v11  ;;  %v1021_v15 = vmul.f32 -1.442695, %v101_v11 }
  0xe3   :  { %1235 = vpow2.f32 %v1021_v15 }
  0xeb   :  { %v1234_v13 = vpop.eup %1233 }
  0xec   :  { %116 = vrot.lane.b32.xlu0 %v1234_v13, %s1324_s21 }
  0xed   :  { %v1236_v16 = vpop.eup %1235 }
  0xee   :  { %v105_v17 = vadd.f32 1.0, %v1236_v16  ;;  %v1030_v16 = vld [vmem:[%s1557_s0 + $0x6] sm:$0x3] }
  0xf0   :  { %111 = vrot.lane.b32.xlu0 %v109_v14, %s1325_s22  ;;  %1237 = vrcp.f32 %v105_v17 }
  0xfa   :  { %v1238_v18 = vpop.eup %1237 }
 0x15e   :  { %v117_v19 = vpop.permute.xlu0 %116 }
 0x15f   :  { %v119_v20 = vmul.f32 %v1238_v18, %v117_v19 }
 0x161   :  { %121 = vrot.lane.b32.xlu1 %v119_v20, %s1325_s22 }
 0x162   :  { %v112_v21 = vpop.permute.xlu0 %111 }
 0x163   :  { %v114_v22 = vmul.f32 %v1238_v18, %v112_v21 }
 0x1d3   :  { %v122_v23 = vpop.permute.xlu1 %121 }
 0x1d4   :  { %v124_v24 = vadd.f32 %v122_v23, %v114_v22 }
 0x1d6   :  { %1239 = vtanh.f32 %v124_v24 }
 0x1e0   :  { %v1240_v25 = vpop.eup %1239 }
 0x1e1   :  { %127 = vrot.lane.b32.xlu1 %v1240_v25, %s1324_s21 }
 0x1e5   :  { %132 = vrot.lane.b32.xlu1 %v124_v24, %s1326_s23 }
 0x253   :  { %v128_v26 = vpop.permute.xlu1 %127 }
 0x254   :  { %v130_v27 = vmul.f32 %v1238_v18, %v128_v26 }
 0x256   :  { %138 = vrot.lane.b32.xlu0 %v130_v27, %s1325_s22 }
 0x257   :  { %v133_v28 = vpop.permute.xlu1 %132 }
 0x258   :  { %136 = vst.msk [vmem:[#allocation3] sm:$0x3] %vm18_vm0, %v133_v28 }
 0x25f   :  { %v231_v29 = vld [vmem:[#allocation3] sm:$0x3] }
 0x260   :  { %233 = vrot.lane.b32.xlu1 %v231_v29, %s1325_s22 }
 0x2c8   :  { %v139_v30 = vpop.permute.xlu0 %138 }
 0x2c9   :  { %141 = vst.msk [vmem:[#allocation2] sm:$0x3] %vm18_vm0, %v139_v30  ;;  %142 = vst.msk [vmem:[%s1559_s2] sm:$0x3] %vm18_vm0, %v139_v30 }
 0x2d0   :  { %v145_v31 = vld [vmem:[#allocation2] sm:$0x3] }
 0x2d1   :  { %1110 = vmatmul.mubr.msk.f32.vlgmr.msra.gmra.mrb[0].mxu1 %vm27_vm2, %v145_v31 }
 0x2d2   :  { %1198 = vmatpush3.bf16.msra.mxu1 %v1358_v4  ;;  %1131 = vmatprep.mubr.msk.f32.mxu1 %vm1323_vm1, %v1322_v6  ;;  %v234_v43 = vpop.permute.xlu1 %233 }
 0x2d3   :  { %1199 = vmatprep.subr.bf16.mxu1 %v1321_v3 }
 0x2d6   :  { %1201 = vmatpush3.bf16.msra.mxu1 %v1373_v7 }
 0x2d7   :  { %1208 = vmatprep.subr.bf16.mxu1 %v1321_v3 }
 0x3a4   :  { %v219_v33 = vpop.f32.mrb[0].mxu1 }
 0x3a5   :  { %v223_v34 = vadd.f32 %v1022_v32, %v219_v33  ;;  %v1111_v35 = vpop.f32.mrb[1].mxu1 }
 0x3a7   :  { %1241 = vtanh.f32 %v223_v34  ;;  %v1024_v37 = vmul.f32 -1.442695, %v223_v34 }
 0x3a9   :  { %1243 = vpow2.f32 %v1024_v37 }
 0x3b1   :  { %v1242_v36 = vpop.eup %1241 }
 0x3b2   :  { %238 = vrot.lane.b32.xlu0 %v1242_v36, %s1324_s21 }
 0x3b3   :  { %v1244_v38 = vpop.eup %1243 }
 0x3b4   :  { %v227_v39 = vadd.f32 1.0, %v1244_v38  ;;  %v1034_v38 = vld [vmem:[%s1557_s0 + $0x8] sm:$0x3] }
 0x3b6   :  { %1245 = vrcp.f32 %v227_v39 }
 0x3c0   :  { %v1246_v40 = vpop.eup %1245 }
 0x3c1   :  { %v236_v44 = vmul.f32 %v1246_v40, %v234_v43 }
 0x424   :  { %v239_v41 = vpop.permute.xlu0 %238 }
 0x425   :  { %v241_v42 = vmul.f32 %v1246_v40, %v239_v41 }
 0x427   :  { %243 = vrot.lane.b32.xlu0 %v241_v42, %s1325_s22 }
 0x499   :  { %v244_v45 = vpop.permute.xlu0 %243 }
 0x49a   :  { %v246_v46 = vadd.f32 %v244_v45, %v236_v44 }
 0x49c   :  { %1247 = vtanh.f32 %v246_v46 }
 0x4a6   :  { %v1248_v47 = vpop.eup %1247 }
 0x4a7   :  { %249 = vrot.lane.b32.xlu1 %v1248_v47, %s1324_s21 }
 0x4ab   :  { %254 = vrot.lane.b32.xlu1 %v246_v46, %s1326_s23 }
 0x519   :  { %v250_v48 = vpop.permute.xlu1 %249 }
 0x51a   :  { %v252_v49 = vmul.f32 %v1246_v40, %v250_v48 }
 0x51c   :  { %259 = vrot.lane.b32.xlu0 %v252_v49, %s1325_s22 }
 0x51d   :  { %v255_v50 = vpop.permute.xlu1 %254 }
 0x51e   :  { %257 = vst.msk [vmem:[#allocation3] sm:$0x3] %vm18_vm0, %v255_v50 }
 0x525   :  { %v353_v51 = vld [vmem:[#allocation3] sm:$0x3] }
 0x526   :  { %355 = vrot.lane.b32.xlu1 %v353_v51, %s1325_s22 }
 0x58e   :  { %v260_v52 = vpop.permute.xlu0 %259 }
 0x58f   :  { %262 = vst.msk [vmem:[#allocation2] sm:$0x3] %vm18_vm0, %v260_v52  ;;  %1025 = vst.msk [vmem:[%s1559_s2 + $0x2] sm:$0x3] %vm18_vm0, %v260_v52 }
 0x596   :  { %v267_v53 = vld [vmem:[#allocation2] sm:$0x3] }
 0x597   :  { %1121 = vmatmul.mubr.msk.f32.vlgmr.msra.gmra.mrb[2].mxu0 %vm27_vm2, %v267_v53 }
 0x598   :  { %1204 = vmatpush3.bf16.msra.mxu0 %v1358_v4  ;;  %1142 = vmatprep.mubr.msk.f32.mxu0 %vm1323_vm1, %v1322_v6  ;;  %v356_v1 = vpop.permute.xlu1 %355 }
 0x599   :  { %1205 = vmatprep.subr.bf16.mxu0 %v1321_v3 }
 0x59c   :  { %1207 = vmatpush3.bf16.msra.mxu0 %v1373_v7 }
 0x59d   :  { %1214 = vmatprep.subr.bf16.mxu0 %v1321_v3 }
 0x66a   :  { %v341_v55 = vpop.f32.mrb[2].mxu0 }
 0x66b   :  { %v345_v56 = vadd.f32 %v1026_v54, %v341_v55  ;;  %v1122_v57 = vpop.f32.mrb[3].mxu0 }
 0x66d   :  { %1249 = vtanh.f32 %v345_v56  ;;  %v1028_v59 = vmul.f32 -1.442695, %v345_v56 }
 0x66f   :  { %1251 = vpow2.f32 %v1028_v59 }
 0x677   :  { %v1250_v58 = vpop.eup %1249 }
 0x678   :  { %360 = vrot.lane.b32.xlu0 %v1250_v58, %s1324_s21 }
 0x679   :  { %v1252_v60 = vpop.eup %1251 }
 0x67a   :  { %v349_v61 = vadd.f32 1.0, %v1252_v60  ;;  %v1038_v60 = vld [vmem:[%s1557_s0 + $0xa] sm:$0x3] }
 0x67c   :  { %1253 = vrcp.f32 %v349_v61 }
 0x686   :  { %v1254_v62 = vpop.eup %1253 }
 0x687   :  { %v358_v2 = vmul.f32 %v1254_v62, %v356_v1 }
 0x6ea   :  { %v361_v63 = vpop.permute.xlu0 %360 }
 0x6eb   :  { %v363_v0 = vmul.f32 %v1254_v62, %v361_v63 }
 0x6ed   :  { %365 = vrot.lane.b32.xlu0 %v363_v0, %s1325_s22 }
 0x75f   :  { %v366_v5 = vpop.permute.xlu0 %365 }
 0x760   :  { %v368_v8 = vadd.f32 %v366_v5, %v358_v2 }
 0x762   :  { %1255 = vtanh.f32 %v368_v8 }
 0x76c   :  { %v1256_v9 = vpop.eup %1255 }
 0x76d   :  { %371 = vrot.lane.b32.xlu1 %v1256_v9, %s1324_s21 }
 0x771   :  { %376 = vrot.lane.b32.xlu1 %v368_v8, %s1326_s23 }
 0x7df   :  { %v372_v10 = vpop.permute.xlu1 %371 }
 0x7e0   :  { %v374_v11 = vmul.f32 %v1254_v62, %v372_v10 }
 0x7e2   :  { %381 = vrot.lane.b32.xlu0 %v374_v11, %s1325_s22 }
 0x7e3   :  { %v377_v12 = vpop.permute.xlu1 %376 }
 0x7e4   :  { %379 = vst.msk [vmem:[#allocation3] sm:$0x3] %vm18_vm0, %v377_v12 }
 0x7eb   :  { %v475_v13 = vld [vmem:[#allocation3] sm:$0x3] }
 0x7ec   :  { %477 = vrot.lane.b32.xlu1 %v475_v13, %s1325_s22 }
 0x854   :  { %v382_v14 = vpop.permute.xlu0 %381 }
 0x855   :  { %384 = vst.msk [vmem:[#allocation2] sm:$0x3] %vm18_vm0, %v382_v14  ;;  %1029 = vst.msk [vmem:[%s1559_s2 + $0x4] sm:$0x3] %vm18_vm0, %v382_v14 }
 0x85c   :  { %v389_v15 = vld [vmem:[#allocation2] sm:$0x3] }
 0x85d   :  { %1132 = vmatmul.mubr.msk.f32.vlgmr.msra.gmra.mrb[2].mxu1 %vm27_vm2, %v389_v15 }
 0x85e   :  { %1210 = vmatpush3.bf16.msra.mxu1 %v1358_v4  ;;  %1153 = vmatprep.mubr.msk.f32.mxu1 %vm1323_vm1, %v1322_v6  ;;  %v478_v27 = vpop.permute.xlu1 %477 }
 0x85f   :  { %1211 = vmatprep.subr.bf16.mxu1 %v1321_v3 }
 0x862   :  { %1213 = vmatpush3.bf16.msra.mxu1 %v1373_v7 }
 0x863   :  { %1220 = vmatprep.subr.bf16.mxu1 %v1321_v3 }
 0x930   :  { %v463_v17 = vpop.f32.mrb[2].mxu1 }
 0x931   :  { %v467_v18 = vadd.f32 %v1030_v16, %v463_v17  ;;  %v1133_v19 = vpop.f32.mrb[3].mxu1 }
 0x933   :  { %1257 = vtanh.f32 %v467_v18  ;;  %v1032_v21 = vmul.f32 -1.442695, %v467_v18  ;;  %v1042_v18 = vld [vmem:[%s1557_s0 + $0xc] sm:$0x3] }
 0x935   :  { %1259 = vpow2.f32 %v1032_v21 }
 0x93d   :  { %v1258_v20 = vpop.eup %1257 }
 0x93e   :  { %482 = vrot.lane.b32.xlu0 %v1258_v20, %s1324_s21 }
 0x93f   :  { %v1260_v22 = vpop.eup %1259 }
 0x940   :  { %v471_v23 = vadd.f32 1.0, %v1260_v22 }
 0x942   :  { %1261 = vrcp.f32 %v471_v23 }
 0x94c   :  { %v1262_v24 = vpop.eup %1261 }
 0x94d   :  { %v480_v28 = vmul.f32 %v1262_v24, %v478_v27 }
 0x9b0   :  { %v483_v25 = vpop.permute.xlu0 %482 }
 0x9b1   :  { %v485_v26 = vmul.f32 %v1262_v24, %v483_v25 }
 0x9b3   :  { %487 = vrot.lane.b32.xlu0 %v485_v26, %s1325_s22 }
 0xa25   :  { %v488_v29 = vpop.permute.xlu0 %487 }
 0xa26   :  { %v490_v30 = vadd.f32 %v488_v29, %v480_v28 }
 0xa28   :  { %1263 = vtanh.f32 %v490_v30 }
 0xa32   :  { %v1264_v31 = vpop.eup %1263 }
 0xa33   :  { %493 = vrot.lane.b32.xlu1 %v1264_v31, %s1324_s21 }
 0xa37   :  { %498 = vrot.lane.b32.xlu1 %v490_v30, %s1326_s23 }
 0xaa5   :  { %v494_v32 = vpop.permute.xlu1 %493 }
 0xaa6   :  { %v496_v33 = vmul.f32 %v1262_v24, %v494_v32 }
 0xaa8   :  { %503 = vrot.lane.b32.xlu0 %v496_v33, %s1325_s22 }
 0xaa9   :  { %v499_v34 = vpop.permute.xlu1 %498 }
 0xaaa   :  { %501 = vst.msk [vmem:[#allocation3] sm:$0x3] %vm18_vm0, %v499_v34 }
 0xab1   :  { %v597_v35 = vld [vmem:[#allocation3] sm:$0x3] }
 0xab2   :  { %599 = vrot.lane.b32.xlu1 %v597_v35, %s1325_s22 }
 0xb1a   :  { %v504_v36 = vpop.permute.xlu0 %503 }
 0xb1b   :  { %506 = vst.msk [vmem:[#allocation2] sm:$0x3] %vm18_vm0, %v504_v36  ;;  %1033 = vst.msk [vmem:[%s1559_s2 + $0x6] sm:$0x3] %vm18_vm0, %v504_v36 }
 0xb22   :  { %v511_v37 = vld [vmem:[#allocation2] sm:$0x3] }
 0xb23   :  { %1143 = vmatmul.mubr.msk.f32.vlgmr.msra.gmra.mrb[4].mxu0 %vm27_vm2, %v511_v37 }
 0xb24   :  { %1216 = vmatpush3.bf16.msra.mxu0 %v1358_v4  ;;  %1164 = vmatprep.mubr.msk.f32.mxu0 %vm1323_vm1, %v1322_v6  ;;  %v600_v49 = vpop.permute.xlu1 %599 }
 0xb25   :  { %1217 = vmatprep.subr.bf16.mxu0 %v1321_v3 }
 0xb28   :  { %1219 = vmatpush3.bf16.msra.mxu0 %v1373_v7 }
 0xbf6   :  { %v585_v39 = vpop.f32.mrb[4].mxu0 }
 0xbf7   :  { %v589_v40 = vadd.f32 %v1034_v38, %v585_v39  ;;  %v1144_v41 = vpop.f32.mrb[5].mxu0 }
 0xbf9   :  { %1265 = vtanh.f32 %v589_v40  ;;  %v1036_v43 = vmul.f32 -1.442695, %v589_v40  ;;  %v1046_v40 = vld [vmem:[%s1557_s0 + $0xe] sm:$0x3]  ;;  %s1327_s0 = smov [#allocation4]  }
 0xbfa   :  { %s1010_s27 = sshll.u32 %s1327_s0, 4  ;;  %s1011_s27 = int_to_ptr.vmem [resolvable:$true] %s1010_s27 }
 0xbfb   :  { %1267 = vpow2.f32 %v1036_v43  ;;  %s1297_s28 = scalar_lea.vmem %s1011_s27, 32  ;;  %p1302_p1 = scmp.lt.s32.totalorder %s1011_s27, %s1011_s27 }
 0xbfc   :  { %p1298_p0 = scmp.ne.s32.totalorder %s1011_s27, %s1297_s28  ;;  %p1303_p2 = scmp.lt.s32.totalorder %s1297_s28, %s1297_s28 }
 0xbfe   :  { %p1304_p3 = por %p1303_p2, %p1302_p1 }
 0xc00   :  { %p1305_p4 = pnand %p1304_p3, %p1298_p0 }
 0xc03   :  { %v1266_v42 = vpop.eup %1265 }
 0xc04   :  { %604 = vrot.lane.b32.xlu0 %v1266_v42, %s1324_s21 }
 0xc05   :  { %v1268_v44 = vpop.eup %1267 }
 0xc06   :  { %v593_v45 = vadd.f32 1.0, %v1268_v44 }
 0xc08   :  { %1269 = vrcp.f32 %v593_v45 }
 0xc12   :  { %v1270_v46 = vpop.eup %1269 }
 0xc13   :  { %v602_v50 = vmul.f32 %v1270_v46, %v600_v49 }
 0xc76   :  { %v605_v47 = vpop.permute.xlu0 %604 }
 0xc77   :  { %v607_v48 = vmul.f32 %v1270_v46, %v605_v47 }
 0xc79   :  { %609 = vrot.lane.b32.xlu0 %v607_v48, %s1325_s22 }
 0xceb   :  { %v610_v51 = vpop.permute.xlu0 %609 }
 0xcec   :  { %v612_v52 = vadd.f32 %v610_v51, %v602_v50 }
 0xcee   :  { %1271 = vtanh.f32 %v612_v52 }
 0xcf8   :  { %v1272_v53 = vpop.eup %1271 }
 0xcf9   :  { %615 = vrot.lane.b32.xlu1 %v1272_v53, %s1324_s21 }
 0xcfd   :  { %620 = vrot.lane.b32.xlu1 %v612_v52, %s1326_s23 }
 0xd6b   :  { %v616_v54 = vpop.permute.xlu1 %615 }
 0xd6c   :  { %v618_v55 = vmul.f32 %v1270_v46, %v616_v54 }
 0xd6e   :  { %625 = vrot.lane.b32.xlu0 %v618_v55, %s1325_s22 }
 0xd6f   :  { %v621_v56 = vpop.permute.xlu1 %620 }
 0xd70   :  { %623 = vst.msk [vmem:[#allocation3] sm:$0x3] %vm18_vm0, %v621_v56 }
 0xd77   :  { %v719_v57 = vld [vmem:[#allocation3] sm:$0x3] }
 0xd78   :  { %721 = vrot.lane.b32.xlu1 %v719_v57, %s1325_s22 }
 0xde0   :  { %v626_v58 = vpop.permute.xlu0 %625 }
 0xde1   :  { %628 = vst.msk [vmem:[#allocation2] sm:$0x3] %vm18_vm0, %v626_v58  ;;  %1037 = vst.msk [vmem:[%s1559_s2 + $0x8] sm:$0x3] %vm18_vm0, %v626_v58 }
 0xde8   :  { %v633_v59 = vld [vmem:[#allocation2] sm:$0x3] }
 0xde9   :  { %1154 = vmatmul.mubr.msk.f32.vlgmr.msra.gmra.mrb[4].mxu1 %vm27_vm2, %v633_v59 }
 0xdea   :  { %1222 = vmatpush3.bf16.msra.mxu1 %v1358_v4  ;;  %1175 = vmatprep.mubr.msk.f32.mxu1 %vm1323_vm1, %v1322_v6 }
 0xdeb   :  { %1223 = vmatprep.subr.bf16.mxu1 %v1321_v3 }
 0xdee   :  { %1225 = vmatpush3.bf16.msra.mxu1 %v1373_v7  ;;  %v722_v7 = vpop.permute.xlu1 %721 }
 0xebc   :  { %v707_v61 = vpop.f32.mrb[4].mxu1 }
 0xebd   :  { %v711_v62 = vadd.f32 %v1038_v60, %v707_v61  ;;  %v1155_v63 = vpop.f32.mrb[5].mxu1 }
 0xebf   :  { %1273 = vtanh.f32 %v711_v62  ;;  %v1040_v1 = vmul.f32 -1.442695, %v711_v62 }
 0xec1   :  { %1275 = vpow2.f32 %v1040_v1 }
 0xec9   :  { %v1274_v0 = vpop.eup %1273 }
 0xeca   :  { %726 = vrot.lane.b32.xlu0 %v1274_v0, %s1324_s21 }
 0xecb   :  { %v1276_v4 = vpop.eup %1275 }
 0xecc   :  { %v715_v2 = vadd.f32 1.0, %v1276_v4 }
 0xece   :  { %1277 = vrcp.f32 %v715_v2 }
 0xed8   :  { %v1278_v6 = vpop.eup %1277 }
 0xed9   :  { %v724_v8 = vmul.f32 %v1278_v6, %v722_v7 }
 0xf3c   :  { %v727_v3 = vpop.permute.xlu0 %726 }
 0xf3d   :  { %v729_v5 = vmul.f32 %v1278_v6, %v727_v3 }
 0xf3f   :  { %731 = vrot.lane.b32.xlu0 %v729_v5, %s1325_s22 }
 0xfb1   :  { %v732_v9 = vpop.permute.xlu0 %731 }
 0xfb2   :  { %v734_v10 = vadd.f32 %v732_v9, %v724_v8 }
 0xfb4   :  { %1279 = vtanh.f32 %v734_v10 }
 0xfbe   :  { %v1280_v11 = vpop.eup %1279 }
 0xfbf   :  { %737 = vrot.lane.b32.xlu1 %v1280_v11, %s1324_s21 }
 0xfc3   :  { %742 = vrot.lane.b32.xlu1 %v734_v10, %s1326_s23 }
0x1031   :  { %v738_v12 = vpop.permute.xlu1 %737 }
0x1032   :  { %v740_v13 = vmul.f32 %v1278_v6, %v738_v12 }
0x1034   :  { %747 = vrot.lane.b32.xlu0 %v740_v13, %s1325_s22 }
0x1035   :  { %v743_v14 = vpop.permute.xlu1 %742 }
0x1036   :  { %745 = vst.msk [vmem:[#allocation3] sm:$0x3] %vm18_vm0, %v743_v14 }
0x103d   :  { %v841_v15 = vld [vmem:[#allocation3] sm:$0x3] }
0x103e   :  { %843 = vrot.lane.b32.xlu1 %v841_v15, %s1325_s22 }
0x10a6   :  { %v748_v16 = vpop.permute.xlu0 %747 }
0x10a7   :  { %750 = vst.msk [vmem:[#allocation2] sm:$0x3] %vm18_vm0, %v748_v16  ;;  %1041 = vst.msk [vmem:[%s1559_s2 + $0xa] sm:$0x3] %vm18_vm0, %v748_v16 }
0x10ae   :  { %v755_v17 = vld [vmem:[#allocation2] sm:$0x3] }
0x10af   :  { %1165 = vmatmul.mubr.msk.f32.vlgmr.msra.gmra.mrb[6].mxu0 %vm27_vm2, %v755_v17 }
0x10b0   :  { %v844_v29 = vpop.permute.xlu1 %843 }
0x1182   :  { %v829_v19 = vpop.f32.mrb[6].mxu0 }
0x1183   :  { %v833_v20 = vadd.f32 %v1042_v18, %v829_v19  ;;  %v1166_v21 = vpop.f32.mrb[7].mxu0 }
0x1185   :  { %1281 = vtanh.f32 %v833_v20  ;;  %v1044_v23 = vmul.f32 -1.442695, %v833_v20 }
0x1187   :  { %1283 = vpow2.f32 %v1044_v23 }
0x118f   :  { %v1282_v22 = vpop.eup %1281 }
0x1190   :  { %848 = vrot.lane.b32.xlu0 %v1282_v22, %s1324_s21 }
0x1191   :  { %v1284_v24 = vpop.eup %1283 }
0x1192   :  { %v837_v25 = vadd.f32 1.0, %v1284_v24 }
0x1194   :  { %1285 = vrcp.f32 %v837_v25 }
0x119e   :  { %v1286_v26 = vpop.eup %1285 }
0x119f   :  { %v846_v30 = vmul.f32 %v1286_v26, %v844_v29 }
0x1202   :  { %v849_v27 = vpop.permute.xlu0 %848 }
0x1203   :  { %v851_v28 = vmul.f32 %v1286_v26, %v849_v27 }
0x1205   :  { %853 = vrot.lane.b32.xlu0 %v851_v28, %s1325_s22 }
0x1277   :  { %v854_v31 = vpop.permute.xlu0 %853 }
0x1278   :  { %v856_v32 = vadd.f32 %v854_v31, %v846_v30 }
0x127a   :  { %1287 = vtanh.f32 %v856_v32 }
0x1284   :  { %v1288_v33 = vpop.eup %1287 }
0x1285   :  { %859 = vrot.lane.b32.xlu1 %v1288_v33, %s1324_s21 }
0x1289   :  { %864 = vrot.lane.b32.xlu1 %v856_v32, %s1326_s23 }
0x12f7   :  { %v860_v34 = vpop.permute.xlu1 %859 }
0x12f8   :  { %v862_v35 = vmul.f32 %v1286_v26, %v860_v34 }
0x12fa   :  { %869 = vrot.lane.b32.xlu0 %v862_v35, %s1325_s22 }
0x12fb   :  { %v865_v36 = vpop.permute.xlu1 %864 }
0x12fc   :  { %867 = vst.msk [vmem:[#allocation3] sm:$0x3] %vm18_vm0, %v865_v36 }
0x1303   :  { %v963_v37 = vld [vmem:[#allocation3] sm:$0x3] }
0x1304   :  { %965 = vrot.lane.b32.xlu1 %v963_v37, %s1325_s22 }
0x136c   :  { %v870_v38 = vpop.permute.xlu0 %869 }
0x136d   :  { %872 = vst.msk [vmem:[#allocation2] sm:$0x3] %vm18_vm0, %v870_v38  ;;  %1045 = vst.msk [vmem:[%s1559_s2 + $0xc] sm:$0x3] %vm18_vm0, %v870_v38 }
0x1374   :  { %v877_v39 = vld [vmem:[#allocation2] sm:$0x3] }
0x1375   :  { %1176 = vmatmul.mubr.msk.f32.vlgmr.msra.gmra.mrb[6].mxu1 %vm27_vm2, %v877_v39 }
0x1376   :  { %v966_v51 = vpop.permute.xlu1 %965 }
0x1448   :  { %v951_v41 = vpop.f32.mrb[6].mxu1 }
0x1449   :  { %v955_v42 = vadd.f32 %v1046_v40, %v951_v41  ;;  %v1177_v43 = vpop.f32.mrb[7].mxu1 }
0x144b   :  { %1289 = vtanh.f32 %v955_v42  ;;  %v1048_v45 = vmul.f32 -1.442695, %v955_v42 }
0x144d   :  { %1291 = vpow2.f32 %v1048_v45 }
0x1455   :  { %v1290_v44 = vpop.eup %1289 }
0x1456   :  { %970 = vrot.lane.b32.xlu0 %v1290_v44, %s1324_s21 }
0x1457   :  { %v1292_v46 = vpop.eup %1291 }
0x1458   :  { %v959_v47 = vadd.f32 1.0, %v1292_v46 }
0x145a   :  { %1293 = vrcp.f32 %v959_v47 }
0x1464   :  { %v1294_v48 = vpop.eup %1293 }
0x1465   :  { %v968_v52 = vmul.f32 %v1294_v48, %v966_v51 }
0x14c8   :  { %v971_v49 = vpop.permute.xlu0 %970 }
0x14c9   :  { %v973_v50 = vmul.f32 %v1294_v48, %v971_v49 }
0x14cb   :  { %975 = vrot.lane.b32.xlu0 %v973_v50, %s1325_s22 }
0x153d   :  { %v976_v53 = vpop.permute.xlu0 %975 }
0x153e   :  { %v978_v54 = vadd.f32 %v976_v53, %v968_v52 }
0x1540   :  { %1295 = vtanh.f32 %v978_v54  ;;  %986 = vrot.lane.b32.xlu0 %v978_v54, %s1326_s23 }
0x154a   :  { %v1296_v55 = vpop.eup %1295 }
0x154b   :  { %981 = vrot.lane.b32.xlu1 %v1296_v55, %s1324_s21 }
0x15b2   :  { %v987_v56 = vpop.permute.xlu0 %986 }
0x15b3   :  { %989 = vst.msk [vmem:[#allocation3] sm:$0x3] %vm18_vm0, %v987_v56 }
0x15ba   :  { %v1000_v57 = vld [vmem:[#allocation3] sm:$0x3] }
0x15bb   :  { %1001 = vst.msk [vmem:[#allocation4] sm:$0x3] %vm18_vm0, %v1000_v57 }
0x15bc   :  { %1308 = shalt.err (!%p1305_p4)
}
0x15bd   :  { %s1309_s21 = scalar_lea.hbm %s1560_s3, 32 }
0x15be   :  { %p1310_p5 = scmp.ne.s32.totalorder %s1560_s3, %s1309_s21  ;;  %p1313_p6 = scmp.lt.u32.totalorder %s1309_s21, %s1560_s3 }
0x15c0   :  { %p1315_p7 = pnand %p1313_p6, %p1310_p5 }
0x15c2   :  { %1318 = shalt.err (!%p1315_p7)
}
0x15c3   :  { %1013 = dma.vmem_to_hbm [thread:$0]  %s1011_s27, 32, %s1560_s3, [#allocation5]   ;;  %v982_v58 = vpop.permute.xlu1 %981 }
0x15c4   :  { %v984_v59 = vmul.f32 %v1294_v48, %v982_v58 }
0x15c6   :  { %991 = vrot.lane.b32.xlu1 %v984_v59, %s1325_s22 }
0x1638   :  { %v992_v60 = vpop.permute.xlu1 %991 }
0x1639   :  { %994 = vst.msk [vmem:[#allocation2] sm:$0x3] %vm18_vm0, %v992_v60  ;;  %1049 = vst.msk [vmem:[%s1559_s2 + $0xe] sm:$0x3] %vm18_vm0, %v992_v60 }
0x163a   :  { %1319 = dma.done.wait [#allocation5], 32  }
0x163b   :  { %1320 = vsyncadd [#allocation5], 4294967264 }
0x163c   :  { %1019 = vsyncpa [#allocation5], 1 }

</bundles_post_ra>
